<compile_context>
chip_gen: v7x
topology: tpu7x:2x2x1
jax: 0.10.0
libtpu: 0.0.40
codegen_flags: <defaults>
</compile_context>

<pallas_src>
import jax
import jax.numpy as jnp
from jax import lax
from jax.experimental import pallas as pl
from jax.experimental.pallas import tpu as pltpu

# ---------------- model config (small, consistent with CLIP-ViT structure) ---
BATCH = 2
IN_CH = 3
IMG = 16
PATCH = 8
GRID = IMG // PATCH                 # 2
N_PATCH = GRID * GRID               # 4
TOKENS = N_PATCH + 1                # 5  (cls token + patches)
WIDTH = 32                          # transformer width
HEADS = 4
HEAD_DIM = WIDTH // HEADS           # 8
LAYERS = 2
EMBED = 16                          # CLIP joint embedding dim
N_CLASSES = 2                       # two text prompts ("positive"/"negative")
LN_EPS = 1e-5
CPP = IN_CH * PATCH * PATCH         # 192 = im2col row length

BT = BATCH * TOKENS                 # 10 = folded sequence length
ST = HEADS * BT                     # 40 = head-stacked sequence length
_LANES = 128                        # slab lane width

# ---- bf16 matmul-weight slab layout (rows; all offsets multiples of 16) -----
_W_CONV = 0                                   # [CPP, WIDTH]
_W_LAYER0 = CPP                               # per-layer block:
#   +0*W  in_proj_wt  [W, 3W]   (q columns pre-scaled by 1/sqrt(hd))
#   +1*W  out_proj_wt [W, W]
#   +2*W  fc_wt       [W, 4W]
#   +3*W  cproj_wt    [4W, W]
_W_LAYER_STRIDE = 7 * WIDTH                   # 224
_W_ROWS = -(-(_W_LAYER0 + _W_LAYER_STRIDE * LAYERS) // 16) * 16   # 640

# ---- f32 vector slab layout (rows) ------------------------------------------
_V_BIAS = 0                                   # [ST, ST] additive attention mask
_V_PROJ = _V_BIAS + ST                        # [WIDTH, EMBED] visual projection
_V_TEXT = _V_PROJ + WIDTH                     # [EMBED, N_CLASSES] = 100 * norm(text)^T
_V_EMBED = _V_TEXT + EMBED                    # [BT, WIDTH] class+pos embed, tiled over batch
_V_LNPRE_G = _V_EMBED + BT
_V_LNPRE_B = _V_LNPRE_G + 1
_V_LNPOST_G = _V_LNPRE_B + 1
_V_LNPOST_B = _V_LNPOST_G + 1
_V_LAYER0 = _V_LNPOST_B + 1                   # per-layer block of 8 rows:
#   +0 ln1_g  +1 ln1_b  +2 ln2_g  +3 ln2_b
#   +4 in_proj_b [3W]  +5 out_proj_b [W]  +6 fc_b [4W]  +7 cproj_b [W]
_V_LAYER_STRIDE = 8
_V_ROWS = -(-(_V_LAYER0 + _V_LAYER_STRIDE * LAYERS) // 8) * 8     # 120


# ----------------------------- fused Pallas kernel ---------------------------
def _clip_fwd_kernel(patches_ref, wslab_ref, vslab_ref, sim_ref):
    f32 = jnp.float32
    bf16 = jnp.bfloat16

    def mm(a, w_bf16):
        # bf16 MXU operands (weights pre-cast at prep time), fp32 accumulation.
        return jnp.dot(a.astype(bf16), w_bf16, preferred_element_type=f32)

    def ln(x, g, b):
        mu = jnp.mean(x, axis=-1, keepdims=True)
        xc = x - mu
        var = jnp.mean(xc * xc, axis=-1, keepdims=True)
        return xc * lax.rsqrt(var + LN_EPS) * g + b

    # ---- one-time slab slices (static, hoisted out of the layer loop) -------
    attn_bias = vslab_ref[_V_BIAS:_V_BIAS + ST, 0:ST]              # [40, 40]
    embed = vslab_ref[_V_EMBED:_V_EMBED + BT, 0:WIDTH]             # [10, 32]
    ln_pre_g = vslab_ref[_V_LNPRE_G:_V_LNPRE_G + 1, 0:WIDTH]
    ln_pre_b = vslab_ref[_V_LNPRE_B:_V_LNPRE_B + 1, 0:WIDTH]

    # ---- patch embedding + (class+pos) embedding (both images at once) ------
    x = patches_ref[...]                                           # [10, 192]
    seq = mm(x, wslab_ref[_W_CONV:_W_CONV + CPP, 0:WIDTH]) + embed  # [10, 32]
    seq = ln(seq, ln_pre_g, ln_pre_b)

    # ---- transformer layers (statically unrolled) ----------------------------
    for l in range(LAYERS):
        wb = _W_LAYER0 + l * _W_LAYER_STRIDE
        vb = _V_LAYER0 + l * _V_LAYER_STRIDE
        ln1_g = vslab_ref[vb + 0:vb + 1, 0:WIDTH]
        ln1_b = vslab_ref[vb + 1:vb + 2, 0:WIDTH]
        ln2_g = vslab_ref[vb + 2:vb + 3, 0:WIDTH]
        ln2_b = vslab_ref[vb + 3:vb + 4, 0:WIDTH]
        in_b = vslab_ref[vb + 4:vb + 5, 0:3 * WIDTH]
        out_b = vslab_ref[vb + 5:vb + 6, 0:WIDTH]
        fc_b = vslab_ref[vb + 6:vb + 7, 0:4 * WIDTH]
        cp_b = vslab_ref[vb + 7:vb + 8, 0:WIDTH]

        # -- self-attention: x = x + out_proj(attn(ln_1(x)))
        h = ln(seq, ln1_g, ln1_b)
        qkv = mm(h, wslab_ref[wb:wb + WIDTH, 0:3 * WIDTH]) + in_b  # [10, 96]
        # Stack heads (and both images) along the sublane axis -> [H*B*T, hd].
        q_st = jnp.concatenate(
            [qkv[:, hh * HEAD_DIM:(hh + 1) * HEAD_DIM] for hh in range(HEADS)],
            axis=0)                                                # [40, 8] (q pre-scaled)
        k_st = jnp.concatenate(
            [qkv[:, WIDTH + hh * HEAD_DIM:WIDTH + (hh + 1) * HEAD_DIM]
             for hh in range(HEADS)], axis=0)                      # [40, 8]
        v_st = jnp.concatenate(
            [qkv[:, 2 * WIDTH + hh * HEAD_DIM:2 * WIDTH + (hh + 1) * HEAD_DIM]
             for hh in range(HEADS)], axis=0)                      # [40, 8]

        # One scores matmul for all heads/images; block mask keeps each
        # (head, image) softmax confined to its own 5-key block.
        s = lax.dot_general(q_st.astype(bf16), k_st.astype(bf16),
                            (((1,), (1,)), ((), ())),
                            preferred_element_type=f32) + attn_bias  # [40, 40]
        s = s - jnp.max(s, axis=-1, keepdims=True)   # row max is in-block -> exact softmax
        p = jnp.exp(s)
        p = p * pl.reciprocal(jnp.sum(p, axis=-1, keepdims=True), approx=True)
        o_st = mm(p, v_st.astype(bf16))                            # [40, 8]
        attn = jnp.concatenate(
            [o_st[hh * BT:(hh + 1) * BT, :] for hh in range(HEADS)], axis=1)  # [10, 32]
        attn = mm(attn, wslab_ref[wb + WIDTH:wb + 2 * WIDTH, 0:WIDTH]) + out_b
        seq = seq + attn

        # -- MLP: x = x + c_proj(QuickGELU(c_fc(ln_2(x))))
        h = ln(seq, ln2_g, ln2_b)
        h = mm(h, wslab_ref[wb + 2 * WIDTH:wb + 3 * WIDTH, 0:4 * WIDTH]) + fc_b  # [10, 128]
        h = h * jax.nn.sigmoid(1.702 * h)                          # QuickGELU (f32)
        h = mm(h, wslab_ref[wb + 3 * WIDTH:wb + 7 * WIDTH, 0:WIDTH]) + cp_b
        seq = seq + h

    # ---- pooled cls tokens (rows 0 and TOKENS) -> ln_post -> projection ------
    cls = jnp.concatenate([seq[b * TOKENS:b * TOKENS + 1, :] for b in range(BATCH)],
                          axis=0)                                  # [B, 32]
    cls = ln(cls,
             vslab_ref[_V_LNPOST_G:_V_LNPOST_G + 1, 0:WIDTH],
             vslab_ref[_V_LNPOST_B:_V_LNPOST_B + 1, 0:WIDTH])
    feat = jnp.dot(cls, vslab_ref[_V_PROJ:_V_PROJ + WIDTH, 0:EMBED],
                   preferred_element_type=f32)                     # [B, E] (f32)

    # ---- 100 * cosine similarity (text side pre-normalized & pre-scaled) ----
    feat = feat * lax.rsqrt(jnp.sum(feat * feat, axis=-1, keepdims=True) + 1e-12)
    sim_ref[...] = jnp.dot(feat, vslab_ref[_V_TEXT:_V_TEXT + EMBED, 0:N_CLASSES],
                           preferred_element_type=f32)             # [B, C]


# ---------------------------- parameter init ----------------------------------
def init_params(key):
    """PyTorch-layout weights (deterministic stand-in for pretrained CLIP)."""
    std = 0.02
    ks = iter(jax.random.split(key, 16 + LAYERS * 12))

    def nrm(shape):
        return (std * jax.random.normal(next(ks), shape)).astype(jnp.float32)

    params = {
        "conv1_w": nrm((WIDTH, IN_CH, PATCH, PATCH)),   # Conv2d, bias=False
        "class_embedding": nrm((WIDTH,)),
        "pos_embedding": nrm((TOKENS, WIDTH)),
        "ln_pre_g": jnp.ones((WIDTH,), jnp.float32),
        "ln_pre_b": jnp.zeros((WIDTH,), jnp.float32),
        "ln_post_g": jnp.ones((WIDTH,), jnp.float32),
        "ln_post_b": jnp.zeros((WIDTH,), jnp.float32),
        "proj": nrm((WIDTH, EMBED)),                    # visual projection
        "text_features": nrm((N_CLASSES, EMBED)),       # stands in for encode_text
        "layers": [],
    }
    for _ in range(LAYERS):
        params["layers"].append({
            "ln1_g": jnp.ones((WIDTH,), jnp.float32),
            "ln1_b": jnp.zeros((WIDTH,), jnp.float32),
            "in_proj_w": nrm((3 * WIDTH, WIDTH)),       # PyTorch MHA packed qkv
            "in_proj_b": jnp.zeros((3 * WIDTH,), jnp.float32),
            "out_proj_w": nrm((WIDTH, WIDTH)),
            "out_proj_b": jnp.zeros((WIDTH,), jnp.float32),
            "ln2_g": jnp.ones((WIDTH,), jnp.float32),
            "ln2_b": jnp.zeros((WIDTH,), jnp.float32),
            "fc_w": nrm((4 * WIDTH, WIDTH)),            # Linear(width, 4*width)
            "fc_b": jnp.zeros((4 * WIDTH,), jnp.float32),
            "cproj_w": nrm((WIDTH, 4 * WIDTH)),         # Linear(4*width, width)
            "cproj_b": jnp.zeros((WIDTH,), jnp.float32),
        })
    return params


def prepare_params(params):
    """One-time prep: pack everything into one bf16 weight slab + one f32 slab."""
    f32, bf16 = jnp.float32, jnp.bfloat16
    scale = 1.0 / (HEAD_DIM ** 0.5)

    # ---------------- bf16 matmul-weight slab ----------------
    w = jnp.zeros((_W_ROWS, _LANES), f32)
    conv_wt = params["conv1_w"].reshape(WIDTH, CPP).T              # [CPP, W]
    w = w.at[_W_CONV:_W_CONV + CPP, 0:WIDTH].set(conv_wt)
    for l, lp in enumerate(params["layers"]):
        base = _W_LAYER0 + l * _W_LAYER_STRIDE
        ipw = lp["in_proj_w"].T                                    # [W, 3W]
        ipw = ipw.at[:, :WIDTH].multiply(scale)                    # fold 1/sqrt(hd) into q
        w = w.at[base:base + WIDTH, 0:3 * WIDTH].set(ipw)
        w = w.at[base + WIDTH:base + 2 * WIDTH, 0:WIDTH].set(lp["out_proj_w"].T)
        w = w.at[base + 2 * WIDTH:base + 3 * WIDTH, 0:4 * WIDTH].set(lp["fc_w"].T)
        w = w.at[base + 3 * WIDTH:base + 7 * WIDTH, 0:WIDTH].set(lp["cproj_w"].T)
    wslab = w.astype(bf16)

    # ---------------- f32 vector / small-matrix slab ----------------
    v = jnp.zeros((_V_ROWS, _LANES), f32)
    # block-diagonal additive attention mask for the head/image-stacked scores
    gid = jnp.arange(ST) // TOKENS                                 # (head, image) group id
    bias = jnp.where(gid[:, None] == gid[None, :], 0.0, -1e30).astype(f32)
    v = v.at[_V_BIAS:_V_BIAS + ST, 0:ST].set(bias)
    v = v.at[_V_PROJ:_V_PROJ + WIDTH, 0:EMBED].set(params["proj"].astype(f32))
    # text features: normalize, scale by 100, transpose — all folded here
    txt = params["text_features"].astype(f32)
    txt = txt * lax.rsqrt(jnp.sum(txt * txt, axis=-1, keepdims=True) + 1e-12)
    v = v.at[_V_TEXT:_V_TEXT + EMBED, 0:N_CLASSES].set(100.0 * txt.T)
    # class embedding folded into pos-embed row 0 (patch row 0 is zeros), tiled over batch
    embed = params["pos_embedding"].at[0].add(params["class_embedding"])
    v = v.at[_V_EMBED:_V_EMBED + BT, 0:WIDTH].set(jnp.tile(embed, (BATCH, 1)))
    v = v.at[_V_LNPRE_G, 0:WIDTH].set(params["ln_pre_g"])
    v = v.at[_V_LNPRE_B, 0:WIDTH].set(params["ln_pre_b"])
    v = v.at[_V_LNPOST_G, 0:WIDTH].set(params["ln_post_g"])
    v = v.at[_V_LNPOST_B, 0:WIDTH].set(params["ln_post_b"])
    for l, lp in enumerate(params["layers"]):
        base = _V_LAYER0 + l * _V_LAYER_STRIDE
        v = v.at[base + 0, 0:WIDTH].set(lp["ln1_g"])
        v = v.at[base + 1, 0:WIDTH].set(lp["ln1_b"])
        v = v.at[base + 2, 0:WIDTH].set(lp["ln2_g"])
        v = v.at[base + 3, 0:WIDTH].set(lp["ln2_b"])
        ipb = lp["in_proj_b"].at[:WIDTH].multiply(scale)           # fold q scale
        v = v.at[base + 4, 0:3 * WIDTH].set(ipb)
        v = v.at[base + 5, 0:WIDTH].set(lp["out_proj_b"])
        v = v.at[base + 6, 0:4 * WIDTH].set(lp["fc_b"])
        v = v.at[base + 7, 0:WIDTH].set(lp["cproj_b"])
    return {"wslab": wslab, "vslab": v}


# ---------------------------- forward pass ------------------------------------
def clip_sim_model_infer(x, prep):
    """Equivalent of ClipSimModel_Infer.forward; x: [B, C, H, W] NCHW fp32."""
    B, C, H, W = x.shape
    g, p = GRID, PATCH
    # im2col of non-overlapping patches, C-major (matches conv weight flatten).
    patches = (x.reshape(B, C, g, p, g, p)
                 .transpose(0, 2, 4, 1, 3, 5)
                 .reshape(B, g * g, C * p * p)).astype(jnp.float32)
    # Prepend a zero row per image: the patch-embed matmul then produces a zero
    # class-token row, and the class embedding is folded into the embed slab.
    patches = jnp.pad(patches, ((0, 0), (1, 0), (0, 0)))
    patches = patches.reshape(B * TOKENS, CPP)                     # [10, 192]

    vmem = pltpu.MemorySpace.VMEM
    sim = pl.pallas_call(
        _clip_fwd_kernel,
        out_shape=jax.ShapeDtypeStruct((B, N_CLASSES), jnp.float32),
        in_specs=[pl.BlockSpec(memory_space=vmem)] * 3,            # whole arrays in VMEM
        out_specs=pl.BlockSpec(memory_space=vmem),
    )(patches, prep["wslab"], prep["vslab"])

    return jnp.squeeze(sim)   # matches torch .squeeze(); no-op for (2, 2)


# --------------------------------- main ---------------------------------------
if __name__ == "__main__":
    key = jax.random.PRNGKey(0)
    k_param, k_x = jax.random.split(key)
    params = init_params(k_param)
    prep = prepare_params(params)        # one-time weight packing into two slabs
    x = jax.random.normal(k_x, (BATCH, IN_CH, IMG, IMG), dtype=jnp.float32)

    fwd = jax.jit(clip_sim_model_infer)
    sim = jax.block_until_ready(fwd(x, prep))

    assert sim.shape == (BATCH, N_CLASSES), sim.shape
    assert bool(jnp.all(jnp.isfinite(sim))), "non-finite similarity"
    # TODO(synk): text_features come from deterministic init (stand-in for
    # MMM.encode_text of the two tokenized prompts); pretrained fp16 CLIP
    # weights are replaced by small deterministic fp32 weights.
    print("KERNEL_OK")
</pallas_src>

<mosaic_0001>
module attributes {stable_mosaic.version = 11 : i64} {
  func.func @_clip_fwd_kernel(%arg0: memref<10x192xf32, #tpu.memory_space<vmem>>, %arg1: memref<640x128xbf16, #tpu.memory_space<vmem>>, %arg2: memref<120x128xf32, #tpu.memory_space<vmem>>, %arg3: memref<2x2xf32, #tpu.memory_space<vmem>>) attributes {dimension_semantics = [], scalar_prefetch = 0 : i64, scratch_operands = 0 : i64, tpu.core_type = #tpu.core_type<tc>} {
    %c0 = arith.constant 0 : index
    %c0_0 = arith.constant 0 : index
    %0 = vector.load %arg2[%c0, %c0_0] : memref<120x128xf32, #tpu.memory_space<vmem>>, vector<40x40xf32>
    %c88 = arith.constant 88 : index
    %c0_1 = arith.constant 0 : index
    %1 = vector.load %arg2[%c88, %c0_1] : memref<120x128xf32, #tpu.memory_space<vmem>>, vector<10x32xf32>
    %c98 = arith.constant 98 : index
    %c0_2 = arith.constant 0 : index
    %2 = vector.load %arg2[%c98, %c0_2] : memref<120x128xf32, #tpu.memory_space<vmem>>, vector<1x32xf32>
    %c99 = arith.constant 99 : index
    %c0_3 = arith.constant 0 : index
    %3 = vector.load %arg2[%c99, %c0_3] : memref<120x128xf32, #tpu.memory_space<vmem>>, vector<1x32xf32>
    %c0_4 = arith.constant 0 : index
    %c0_5 = arith.constant 0 : index
    %4 = vector.load %arg0[%c0_4, %c0_5] : memref<10x192xf32, #tpu.memory_space<vmem>>, vector<10x192xf32>
    %c0_6 = arith.constant 0 : index
    %c0_7 = arith.constant 0 : index
    %5 = vector.load %arg1[%c0_6, %c0_7] : memref<640x128xbf16, #tpu.memory_space<vmem>>, vector<192x32xbf16>
    %6 = arith.truncf %4 : vector<10x192xf32> to vector<10x192xbf16>
    %cst = arith.constant dense<0.000000e+00> : vector<10x32xf32>
    %7 = tpu.matmul %6, %5, %cst {dimension_numbers = #tpu.dot_dimension_numbers<[1], [0], [0], [1], [0, 0, 1, 1], [], []>} : vector<10x192xbf16>, vector<192x32xbf16>, vector<10x32xf32> -> vector<10x32xf32>
    %8 = arith.addf %7, %1 : vector<10x32xf32>
    %cst_8 = arith.constant dense<0.000000e+00> : vector<10xf32>
    %9 = vector.multi_reduction <add>, %8, %cst_8 [1] : vector<10x32xf32> to vector<10xf32>
    %10 = vector.shape_cast %9 : vector<10xf32> to vector<10x1xf32>
    %cst_9 = arith.constant 3.200000e+01 : f32
    %11 = vector.broadcast %cst_9 : f32 to vector<10x1xf32>
    %12 = arith.divf %10, %11 : vector<10x1xf32>
    %13 = vector.broadcast %12 : vector<10x1xf32> to vector<10x32xf32>
    %14 = arith.subf %8, %13 : vector<10x32xf32>
    %15 = arith.mulf %14, %14 : vector<10x32xf32>
    %cst_10 = arith.constant dense<0.000000e+00> : vector<10xf32>
    %16 = vector.multi_reduction <add>, %15, %cst_10 [1] : vector<10x32xf32> to vector<10xf32>
    %17 = vector.shape_cast %16 : vector<10xf32> to vector<10x1xf32>
    %cst_11 = arith.constant 3.200000e+01 : f32
    %18 = vector.broadcast %cst_11 : f32 to vector<10x1xf32>
    %19 = arith.divf %17, %18 : vector<10x1xf32>
    %cst_12 = arith.constant 9.99999974E-6 : f32
    %20 = vector.broadcast %cst_12 : f32 to vector<10x1xf32>
    %21 = arith.addf %19, %20 : vector<10x1xf32>
    %22 = math.rsqrt %21 : vector<10x1xf32>
    %23 = vector.broadcast %22 : vector<10x1xf32> to vector<10x32xf32>
    %24 = arith.mulf %14, %23 : vector<10x32xf32>
    %25 = vector.broadcast %2 : vector<1x32xf32> to vector<10x32xf32>
    %26 = arith.mulf %24, %25 : vector<10x32xf32>
    %27 = vector.broadcast %3 : vector<1x32xf32> to vector<10x32xf32>
    %28 = arith.addf %26, %27 : vector<10x32xf32>
    %c102 = arith.constant 102 : index
    %c0_13 = arith.constant 0 : index
    %29 = vector.load %arg2[%c102, %c0_13] : memref<120x128xf32, #tpu.memory_space<vmem>>, vector<1x32xf32>
    %c103 = arith.constant 103 : index
    %c0_14 = arith.constant 0 : index
    %30 = vector.load %arg2[%c103, %c0_14] : memref<120x128xf32, #tpu.memory_space<vmem>>, vector<1x32xf32>
    %c104 = arith.constant 104 : index
    %c0_15 = arith.constant 0 : index
    %31 = vector.load %arg2[%c104, %c0_15] : memref<120x128xf32, #tpu.memory_space<vmem>>, vector<1x32xf32>
    %c105 = arith.constant 105 : index
    %c0_16 = arith.constant 0 : index
    %32 = vector.load %arg2[%c105, %c0_16] : memref<120x128xf32, #tpu.memory_space<vmem>>, vector<1x32xf32>
    %c106 = arith.constant 106 : index
    %c0_17 = arith.constant 0 : index
    %33 = vector.load %arg2[%c106, %c0_17] : memref<120x128xf32, #tpu.memory_space<vmem>>, vector<1x96xf32>
    %c107 = arith.constant 107 : index
    %c0_18 = arith.constant 0 : index
    %34 = vector.load %arg2[%c107, %c0_18] : memref<120x128xf32, #tpu.memory_space<vmem>>, vector<1x32xf32>
    %c108 = arith.constant 108 : index
    %c0_19 = arith.constant 0 : index
    %35 = vector.load %arg2[%c108, %c0_19] : memref<120x128xf32, #tpu.memory_space<vmem>>, vector<1x128xf32>
    %c109 = arith.constant 109 : index
    %c0_20 = arith.constant 0 : index
    %36 = vector.load %arg2[%c109, %c0_20] : memref<120x128xf32, #tpu.memory_space<vmem>>, vector<1x32xf32>
    %cst_21 = arith.constant dense<0.000000e+00> : vector<10xf32>
    %37 = vector.multi_reduction <add>, %28, %cst_21 [1] : vector<10x32xf32> to vector<10xf32>
    %38 = vector.shape_cast %37 : vector<10xf32> to vector<10x1xf32>
    %cst_22 = arith.constant 3.200000e+01 : f32
    %39 = vector.broadcast %cst_22 : f32 to vector<10x1xf32>
    %40 = arith.divf %38, %39 : vector<10x1xf32>
    %41 = vector.broadcast %40 : vector<10x1xf32> to vector<10x32xf32>
    %42 = arith.subf %28, %41 : vector<10x32xf32>
    %43 = arith.mulf %42, %42 : vector<10x32xf32>
    %cst_23 = arith.constant dense<0.000000e+00> : vector<10xf32>
    %44 = vector.multi_reduction <add>, %43, %cst_23 [1] : vector<10x32xf32> to vector<10xf32>
    %45 = vector.shape_cast %44 : vector<10xf32> to vector<10x1xf32>
    %cst_24 = arith.constant 3.200000e+01 : f32
    %46 = vector.broadcast %cst_24 : f32 to vector<10x1xf32>
    %47 = arith.divf %45, %46 : vector<10x1xf32>
    %cst_25 = arith.constant 9.99999974E-6 : f32
    %48 = vector.broadcast %cst_25 : f32 to vector<10x1xf32>
    %49 = arith.addf %47, %48 : vector<10x1xf32>
    %50 = math.rsqrt %49 : vector<10x1xf32>
    %51 = vector.broadcast %50 : vector<10x1xf32> to vector<10x32xf32>
    %52 = arith.mulf %42, %51 : vector<10x32xf32>
    %53 = vector.broadcast %29 : vector<1x32xf32> to vector<10x32xf32>
    %54 = arith.mulf %52, %53 : vector<10x32xf32>
    %55 = vector.broadcast %30 : vector<1x32xf32> to vector<10x32xf32>
    %56 = arith.addf %54, %55 : vector<10x32xf32>
    %c192 = arith.constant 192 : index
    %c0_26 = arith.constant 0 : index
    %57 = vector.load %arg1[%c192, %c0_26] : memref<640x128xbf16, #tpu.memory_space<vmem>>, vector<32x96xbf16>
    %58 = arith.truncf %56 : vector<10x32xf32> to vector<10x32xbf16>
    %cst_27 = arith.constant dense<0.000000e+00> : vector<10x96xf32>
    %59 = tpu.matmul %58, %57, %cst_27 {dimension_numbers = #tpu.dot_dimension_numbers<[1], [0], [0], [1], [0, 0, 1, 1], [], []>} : vector<10x32xbf16>, vector<32x96xbf16>, vector<10x96xf32> -> vector<10x96xf32>
    %60 = vector.broadcast %33 : vector<1x96xf32> to vector<10x96xf32>
    %61 = arith.addf %59, %60 : vector<10x96xf32>
    %62 = vector.extract_strided_slice %61 {offsets = [0, 0], sizes = [10, 8], strides = [1, 1]} : vector<10x96xf32> to vector<10x8xf32>
    %63 = vector.extract_strided_slice %61 {offsets = [0, 8], sizes = [10, 8], strides = [1, 1]} : vector<10x96xf32> to vector<10x8xf32>
    %64 = vector.extract_strided_slice %61 {offsets = [0, 16], sizes = [10, 8], strides = [1, 1]} : vector<10x96xf32> to vector<10x8xf32>
    %65 = vector.extract_strided_slice %61 {offsets = [0, 24], sizes = [10, 8], strides = [1, 1]} : vector<10x96xf32> to vector<10x8xf32>
    %66 = tpu.concatenate %62, %63, %64, %65 in 0 : vector<10x8xf32>, vector<10x8xf32>, vector<10x8xf32>, vector<10x8xf32> -> vector<40x8xf32>
    %67 = vector.extract_strided_slice %61 {offsets = [0, 32], sizes = [10, 8], strides = [1, 1]} : vector<10x96xf32> to vector<10x8xf32>
    %68 = vector.extract_strided_slice %61 {offsets = [0, 40], sizes = [10, 8], strides = [1, 1]} : vector<10x96xf32> to vector<10x8xf32>
    %69 = vector.extract_strided_slice %61 {offsets = [0, 48], sizes = [10, 8], strides = [1, 1]} : vector<10x96xf32> to vector<10x8xf32>
    %70 = vector.extract_strided_slice %61 {offsets = [0, 56], sizes = [10, 8], strides = [1, 1]} : vector<10x96xf32> to vector<10x8xf32>
    %71 = tpu.concatenate %67, %68, %69, %70 in 0 : vector<10x8xf32>, vector<10x8xf32>, vector<10x8xf32>, vector<10x8xf32> -> vector<40x8xf32>
    %72 = vector.extract_strided_slice %61 {offsets = [0, 64], sizes = [10, 8], strides = [1, 1]} : vector<10x96xf32> to vector<10x8xf32>
    %73 = vector.extract_strided_slice %61 {offsets = [0, 72], sizes = [10, 8], strides = [1, 1]} : vector<10x96xf32> to vector<10x8xf32>
    %74 = vector.extract_strided_slice %61 {offsets = [0, 80], sizes = [10, 8], strides = [1, 1]} : vector<10x96xf32> to vector<10x8xf32>
    %75 = vector.extract_strided_slice %61 {offsets = [0, 88], sizes = [10, 8], strides = [1, 1]} : vector<10x96xf32> to vector<10x8xf32>
    %76 = tpu.concatenate %72, %73, %74, %75 in 0 : vector<10x8xf32>, vector<10x8xf32>, vector<10x8xf32>, vector<10x8xf32> -> vector<40x8xf32>
    %77 = arith.truncf %66 : vector<40x8xf32> to vector<40x8xbf16>
    %78 = arith.truncf %71 : vector<40x8xf32> to vector<40x8xbf16>
    %cst_28 = arith.constant dense<0.000000e+00> : vector<40x40xf32>
    %79 = tpu.matmul %77, %78, %cst_28 {dimension_numbers = #tpu.dot_dimension_numbers<[1], [1], [0], [0], [0, 0, 1, 0], [], []>} : vector<40x8xbf16>, vector<40x8xbf16>, vector<40x40xf32> -> vector<40x40xf32>
    %80 = arith.addf %79, %0 : vector<40x40xf32>
    %cst_29 = arith.constant dense<0xFF800000> : vector<40xf32>
    %81 = vector.multi_reduction <maximumf>, %80, %cst_29 [1] : vector<40x40xf32> to vector<40xf32>
    %82 = vector.shape_cast %81 : vector<40xf32> to vector<40x1xf32>
    %83 = vector.broadcast %82 : vector<40x1xf32> to vector<40x40xf32>
    %84 = arith.subf %80, %83 : vector<40x40xf32>
    %85 = math.exp %84 : vector<40x40xf32>
    %cst_30 = arith.constant dense<0.000000e+00> : vector<40xf32>
    %86 = vector.multi_reduction <add>, %85, %cst_30 [1] : vector<40x40xf32> to vector<40xf32>
    %87 = vector.shape_cast %86 : vector<40xf32> to vector<40x1xf32>
    %88 = tpu.reciprocal %87 {approx = true} : vector<40x1xf32> -> vector<40x1xf32>
    %89 = vector.broadcast %88 : vector<40x1xf32> to vector<40x40xf32>
    %90 = arith.mulf %85, %89 : vector<40x40xf32>
    %91 = arith.truncf %76 : vector<40x8xf32> to vector<40x8xbf16>
    %92 = arith.truncf %90 : vector<40x40xf32> to vector<40x40xbf16>
    %cst_31 = arith.constant dense<0.000000e+00> : vector<40x8xf32>
    %93 = tpu.matmul %92, %91, %cst_31 {dimension_numbers = #tpu.dot_dimension_numbers<[1], [0], [0], [1], [0, 0, 1, 1], [], []>} : vector<40x40xbf16>, vector<40x8xbf16>, vector<40x8xf32> -> vector<40x8xf32>
    %94 = vector.extract_strided_slice %93 {offsets = [0, 0], sizes = [10, 8], strides = [1, 1]} : vector<40x8xf32> to vector<10x8xf32>
    %95 = vector.extract_strided_slice %93 {offsets = [10, 0], sizes = [10, 8], strides = [1, 1]} : vector<40x8xf32> to vector<10x8xf32>
    %96 = vector.extract_strided_slice %93 {offsets = [20, 0], sizes = [10, 8], strides = [1, 1]} : vector<40x8xf32> to vector<10x8xf32>
    %97 = vector.extract_strided_slice %93 {offsets = [30, 0], sizes = [10, 8], strides = [1, 1]} : vector<40x8xf32> to vector<10x8xf32>
    %98 = tpu.concatenate %94, %95, %96, %97 in 1 : vector<10x8xf32>, vector<10x8xf32>, vector<10x8xf32>, vector<10x8xf32> -> vector<10x32xf32>
    %c224 = arith.constant 224 : index
    %c0_32 = arith.constant 0 : index
    %99 = vector.load %arg1[%c224, %c0_32] : memref<640x128xbf16, #tpu.memory_space<vmem>>, vector<32x32xbf16>
    %100 = arith.truncf %98 : vector<10x32xf32> to vector<10x32xbf16>
    %cst_33 = arith.constant dense<0.000000e+00> : vector<10x32xf32>
    %101 = tpu.matmul %100, %99, %cst_33 {dimension_numbers = #tpu.dot_dimension_numbers<[1], [0], [0], [1], [0, 0, 1, 1], [], []>} : vector<10x32xbf16>, vector<32x32xbf16>, vector<10x32xf32> -> vector<10x32xf32>
    %102 = vector.broadcast %34 : vector<1x32xf32> to vector<10x32xf32>
    %103 = arith.addf %101, %102 : vector<10x32xf32>
    %104 = arith.addf %28, %103 : vector<10x32xf32>
    %cst_34 = arith.constant dense<0.000000e+00> : vector<10xf32>
    %105 = vector.multi_reduction <add>, %104, %cst_34 [1] : vector<10x32xf32> to vector<10xf32>
    %106 = vector.shape_cast %105 : vector<10xf32> to vector<10x1xf32>
    %cst_35 = arith.constant 3.200000e+01 : f32
    %107 = vector.broadcast %cst_35 : f32 to vector<10x1xf32>
    %108 = arith.divf %106, %107 : vector<10x1xf32>
    %109 = vector.broadcast %108 : vector<10x1xf32> to vector<10x32xf32>
    %110 = arith.subf %104, %109 : vector<10x32xf32>
    %111 = arith.mulf %110, %110 : vector<10x32xf32>
    %cst_36 = arith.constant dense<0.000000e+00> : vector<10xf32>
    %112 = vector.multi_reduction <add>, %111, %cst_36 [1] : vector<10x32xf32> to vector<10xf32>
    %113 = vector.shape_cast %112 : vector<10xf32> to vector<10x1xf32>
    %cst_37 = arith.constant 3.200000e+01 : f32
    %114 = vector.broadcast %cst_37 : f32 to vector<10x1xf32>
    %115 = arith.divf %113, %114 : vector<10x1xf32>
    %cst_38 = arith.constant 9.99999974E-6 : f32
    %116 = vector.broadcast %cst_38 : f32 to vector<10x1xf32>
    %117 = arith.addf %115, %116 : vector<10x1xf32>
    %118 = math.rsqrt %117 : vector<10x1xf32>
    %119 = vector.broadcast %118 : vector<10x1xf32> to vector<10x32xf32>
    %120 = arith.mulf %110, %119 : vector<10x32xf32>
    %121 = vector.broadcast %31 : vector<1x32xf32> to vector<10x32xf32>
    %122 = arith.mulf %120, %121 : vector<10x32xf32>
    %123 = vector.broadcast %32 : vector<1x32xf32> to vector<10x32xf32>
    %124 = arith.addf %122, %123 : vector<10x32xf32>
    %c256 = arith.constant 256 : index
    %c0_39 = arith.constant 0 : index
    %125 = vector.load %arg1[%c256, %c0_39] : memref<640x128xbf16, #tpu.memory_space<vmem>>, vector<32x128xbf16>
    %126 = arith.truncf %124 : vector<10x32xf32> to vector<10x32xbf16>
    %cst_40 = arith.constant dense<0.000000e+00> : vector<10x128xf32>
    %127 = tpu.matmul %126, %125, %cst_40 {dimension_numbers = #tpu.dot_dimension_numbers<[1], [0], [0], [1], [0, 0, 1, 1], [], []>} : vector<10x32xbf16>, vector<32x128xbf16>, vector<10x128xf32> -> vector<10x128xf32>
    %128 = vector.broadcast %35 : vector<1x128xf32> to vector<10x128xf32>
    %129 = arith.addf %127, %128 : vector<10x128xf32>
    %cst_41 = arith.constant 1.702000e+00 : f32
    %130 = vector.broadcast %cst_41 : f32 to vector<10x128xf32>
    %131 = arith.mulf %130, %129 : vector<10x128xf32>
    %132 = arith.negf %131 : vector<10x128xf32>
    %133 = math.exp %132 : vector<10x128xf32>
    %cst_42 = arith.constant 1.000000e+00 : f32
    %134 = vector.broadcast %cst_42 : f32 to vector<10x128xf32>
    %135 = arith.addf %134, %133 : vector<10x128xf32>
    %136 = arith.divf %134, %135 : vector<10x128xf32>
    %137 = arith.mulf %129, %136 : vector<10x128xf32>
    %c288 = arith.constant 288 : index
    %c0_43 = arith.constant 0 : index
    %138 = vector.load %arg1[%c288, %c0_43] : memref<640x128xbf16, #tpu.memory_space<vmem>>, vector<128x32xbf16>
    %139 = arith.truncf %137 : vector<10x128xf32> to vector<10x128xbf16>
    %cst_44 = arith.constant dense<0.000000e+00> : vector<10x32xf32>
    %140 = tpu.matmul %139, %138, %cst_44 {dimension_numbers = #tpu.dot_dimension_numbers<[1], [0], [0], [1], [0, 0, 1, 1], [], []>} : vector<10x128xbf16>, vector<128x32xbf16>, vector<10x32xf32> -> vector<10x32xf32>
    %141 = vector.broadcast %36 : vector<1x32xf32> to vector<10x32xf32>
    %142 = arith.addf %140, %141 : vector<10x32xf32>
    %143 = arith.addf %104, %142 : vector<10x32xf32>
    %c110 = arith.constant 110 : index
    %c0_45 = arith.constant 0 : index
    %144 = vector.load %arg2[%c110, %c0_45] : memref<120x128xf32, #tpu.memory_space<vmem>>, vector<1x32xf32>
    %c111 = arith.constant 111 : index
    %c0_46 = arith.constant 0 : index
    %145 = vector.load %arg2[%c111, %c0_46] : memref<120x128xf32, #tpu.memory_space<vmem>>, vector<1x32xf32>
    %c112 = arith.constant 112 : index
    %c0_47 = arith.constant 0 : index
    %146 = vector.load %arg2[%c112, %c0_47] : memref<120x128xf32, #tpu.memory_space<vmem>>, vector<1x32xf32>
    %c113 = arith.constant 113 : index
    %c0_48 = arith.constant 0 : index
    %147 = vector.load %arg2[%c113, %c0_48] : memref<120x128xf32, #tpu.memory_space<vmem>>, vector<1x32xf32>
    %c114 = arith.constant 114 : index
    %c0_49 = arith.constant 0 : index
    %148 = vector.load %arg2[%c114, %c0_49] : memref<120x128xf32, #tpu.memory_space<vmem>>, vector<1x96xf32>
    %c115 = arith.constant 115 : index
    %c0_50 = arith.constant 0 : index
    %149 = vector.load %arg2[%c115, %c0_50] : memref<120x128xf32, #tpu.memory_space<vmem>>, vector<1x32xf32>
    %c116 = arith.constant 116 : index
    %c0_51 = arith.constant 0 : index
    %150 = vector.load %arg2[%c116, %c0_51] : memref<120x128xf32, #tpu.memory_space<vmem>>, vector<1x128xf32>
    %c117 = arith.constant 117 : index
    %c0_52 = arith.constant 0 : index
    %151 = vector.load %arg2[%c117, %c0_52] : memref<120x128xf32, #tpu.memory_space<vmem>>, vector<1x32xf32>
    %cst_53 = arith.constant dense<0.000000e+00> : vector<10xf32>
    %152 = vector.multi_reduction <add>, %143, %cst_53 [1] : vector<10x32xf32> to vector<10xf32>
    %153 = vector.shape_cast %152 : vector<10xf32> to vector<10x1xf32>
    %cst_54 = arith.constant 3.200000e+01 : f32
    %154 = vector.broadcast %cst_54 : f32 to vector<10x1xf32>
    %155 = arith.divf %153, %154 : vector<10x1xf32>
    %156 = vector.broadcast %155 : vector<10x1xf32> to vector<10x32xf32>
    %157 = arith.subf %143, %156 : vector<10x32xf32>
    %158 = arith.mulf %157, %157 : vector<10x32xf32>
    %cst_55 = arith.constant dense<0.000000e+00> : vector<10xf32>
    %159 = vector.multi_reduction <add>, %158, %cst_55 [1] : vector<10x32xf32> to vector<10xf32>
    %160 = vector.shape_cast %159 : vector<10xf32> to vector<10x1xf32>
    %cst_56 = arith.constant 3.200000e+01 : f32
    %161 = vector.broadcast %cst_56 : f32 to vector<10x1xf32>
    %162 = arith.divf %160, %161 : vector<10x1xf32>
    %cst_57 = arith.constant 9.99999974E-6 : f32
    %163 = vector.broadcast %cst_57 : f32 to vector<10x1xf32>
    %164 = arith.addf %162, %163 : vector<10x1xf32>
    %165 = math.rsqrt %164 : vector<10x1xf32>
    %166 = vector.broadcast %165 : vector<10x1xf32> to vector<10x32xf32>
    %167 = arith.mulf %157, %166 : vector<10x32xf32>
    %168 = vector.broadcast %144 : vector<1x32xf32> to vector<10x32xf32>
    %169 = arith.mulf %167, %168 : vector<10x32xf32>
    %170 = vector.broadcast %145 : vector<1x32xf32> to vector<10x32xf32>
    %171 = arith.addf %169, %170 : vector<10x32xf32>
    %c416 = arith.constant 416 : index
    %c0_58 = arith.constant 0 : index
    %172 = vector.load %arg1[%c416, %c0_58] : memref<640x128xbf16, #tpu.memory_space<vmem>>, vector<32x96xbf16>
    %173 = arith.truncf %171 : vector<10x32xf32> to vector<10x32xbf16>
    %cst_59 = arith.constant dense<0.000000e+00> : vector<10x96xf32>
    %174 = tpu.matmul %173, %172, %cst_59 {dimension_numbers = #tpu.dot_dimension_numbers<[1], [0], [0], [1], [0, 0, 1, 1], [], []>} : vector<10x32xbf16>, vector<32x96xbf16>, vector<10x96xf32> -> vector<10x96xf32>
    %175 = vector.broadcast %148 : vector<1x96xf32> to vector<10x96xf32>
    %176 = arith.addf %174, %175 : vector<10x96xf32>
    %177 = vector.extract_strided_slice %176 {offsets = [0, 0], sizes = [10, 8], strides = [1, 1]} : vector<10x96xf32> to vector<10x8xf32>
    %178 = vector.extract_strided_slice %176 {offsets = [0, 8], sizes = [10, 8], strides = [1, 1]} : vector<10x96xf32> to vector<10x8xf32>
    %179 = vector.extract_strided_slice %176 {offsets = [0, 16], sizes = [10, 8], strides = [1, 1]} : vector<10x96xf32> to vector<10x8xf32>
    %180 = vector.extract_strided_slice %176 {offsets = [0, 24], sizes = [10, 8], strides = [1, 1]} : vector<10x96xf32> to vector<10x8xf32>
    %181 = tpu.concatenate %177, %178, %179, %180 in 0 : vector<10x8xf32>, vector<10x8xf32>, vector<10x8xf32>, vector<10x8xf32> -> vector<40x8xf32>
    %182 = vector.extract_strided_slice %176 {offsets = [0, 32], sizes = [10, 8], strides = [1, 1]} : vector<10x96xf32> to vector<10x8xf32>
    %183 = vector.extract_strided_slice %176 {offsets = [0, 40], sizes = [10, 8], strides = [1, 1]} : vector<10x96xf32> to vector<10x8xf32>
    %184 = vector.extract_strided_slice %176 {offsets = [0, 48], sizes = [10, 8], strides = [1, 1]} : vector<10x96xf32> to vector<10x8xf32>
    %185 = vector.extract_strided_slice %176 {offsets = [0, 56], sizes = [10, 8], strides = [1, 1]} : vector<10x96xf32> to vector<10x8xf32>
    %186 = tpu.concatenate %182, %183, %184, %185 in 0 : vector<10x8xf32>, vector<10x8xf32>, vector<10x8xf32>, vector<10x8xf32> -> vector<40x8xf32>
    %187 = vector.extract_strided_slice %176 {offsets = [0, 64], sizes = [10, 8], strides = [1, 1]} : vector<10x96xf32> to vector<10x8xf32>
    %188 = vector.extract_strided_slice %176 {offsets = [0, 72], sizes = [10, 8], strides = [1, 1]} : vector<10x96xf32> to vector<10x8xf32>
    %189 = vector.extract_strided_slice %176 {offsets = [0, 80], sizes = [10, 8], strides = [1, 1]} : vector<10x96xf32> to vector<10x8xf32>
    %190 = vector.extract_strided_slice %176 {offsets = [0, 88], sizes = [10, 8], strides = [1, 1]} : vector<10x96xf32> to vector<10x8xf32>
    %191 = tpu.concatenate %187, %188, %189, %190 in 0 : vector<10x8xf32>, vector<10x8xf32>, vector<10x8xf32>, vector<10x8xf32> -> vector<40x8xf32>
    %192 = arith.truncf %181 : vector<40x8xf32> to vector<40x8xbf16>
    %193 = arith.truncf %186 : vector<40x8xf32> to vector<40x8xbf16>
    %cst_60 = arith.constant dense<0.000000e+00> : vector<40x40xf32>
    %194 = tpu.matmul %192, %193, %cst_60 {dimension_numbers = #tpu.dot_dimension_numbers<[1], [1], [0], [0], [0, 0, 1, 0], [], []>} : vector<40x8xbf16>, vector<40x8xbf16>, vector<40x40xf32> -> vector<40x40xf32>
    %195 = arith.addf %194, %0 : vector<40x40xf32>
    %cst_61 = arith.constant dense<0xFF800000> : vector<40xf32>
    %196 = vector.multi_reduction <maximumf>, %195, %cst_61 [1] : vector<40x40xf32> to vector<40xf32>
    %197 = vector.shape_cast %196 : vector<40xf32> to vector<40x1xf32>
    %198 = vector.broadcast %197 : vector<40x1xf32> to vector<40x40xf32>
    %199 = arith.subf %195, %198 : vector<40x40xf32>
    %200 = math.exp %199 : vector<40x40xf32>
    %cst_62 = arith.constant dense<0.000000e+00> : vector<40xf32>
    %201 = vector.multi_reduction <add>, %200, %cst_62 [1] : vector<40x40xf32> to vector<40xf32>
    %202 = vector.shape_cast %201 : vector<40xf32> to vector<40x1xf32>
    %203 = tpu.reciprocal %202 {approx = true} : vector<40x1xf32> -> vector<40x1xf32>
    %204 = vector.broadcast %203 : vector<40x1xf32> to vector<40x40xf32>
    %205 = arith.mulf %200, %204 : vector<40x40xf32>
    %206 = arith.truncf %191 : vector<40x8xf32> to vector<40x8xbf16>
    %207 = arith.truncf %205 : vector<40x40xf32> to vector<40x40xbf16>
    %cst_63 = arith.constant dense<0.000000e+00> : vector<40x8xf32>
    %208 = tpu.matmul %207, %206, %cst_63 {dimension_numbers = #tpu.dot_dimension_numbers<[1], [0], [0], [1], [0, 0, 1, 1], [], []>} : vector<40x40xbf16>, vector<40x8xbf16>, vector<40x8xf32> -> vector<40x8xf32>
    %209 = vector.extract_strided_slice %208 {offsets = [0, 0], sizes = [10, 8], strides = [1, 1]} : vector<40x8xf32> to vector<10x8xf32>
    %210 = vector.extract_strided_slice %208 {offsets = [10, 0], sizes = [10, 8], strides = [1, 1]} : vector<40x8xf32> to vector<10x8xf32>
    %211 = vector.extract_strided_slice %208 {offsets = [20, 0], sizes = [10, 8], strides = [1, 1]} : vector<40x8xf32> to vector<10x8xf32>
    %212 = vector.extract_strided_slice %208 {offsets = [30, 0], sizes = [10, 8], strides = [1, 1]} : vector<40x8xf32> to vector<10x8xf32>
    %213 = tpu.concatenate %209, %210, %211, %212 in 1 : vector<10x8xf32>, vector<10x8xf32>, vector<10x8xf32>, vector<10x8xf32> -> vector<10x32xf32>
    %c448 = arith.constant 448 : index
    %c0_64 = arith.constant 0 : index
    %214 = vector.load %arg1[%c448, %c0_64] : memref<640x128xbf16, #tpu.memory_space<vmem>>, vector<32x32xbf16>
    %215 = arith.truncf %213 : vector<10x32xf32> to vector<10x32xbf16>
    %cst_65 = arith.constant dense<0.000000e+00> : vector<10x32xf32>
    %216 = tpu.matmul %215, %214, %cst_65 {dimension_numbers = #tpu.dot_dimension_numbers<[1], [0], [0], [1], [0, 0, 1, 1], [], []>} : vector<10x32xbf16>, vector<32x32xbf16>, vector<10x32xf32> -> vector<10x32xf32>
    %217 = vector.broadcast %149 : vector<1x32xf32> to vector<10x32xf32>
    %218 = arith.addf %216, %217 : vector<10x32xf32>
    %219 = arith.addf %143, %218 : vector<10x32xf32>
    %cst_66 = arith.constant dense<0.000000e+00> : vector<10xf32>
    %220 = vector.multi_reduction <add>, %219, %cst_66 [1] : vector<10x32xf32> to vector<10xf32>
    %221 = vector.shape_cast %220 : vector<10xf32> to vector<10x1xf32>
    %cst_67 = arith.constant 3.200000e+01 : f32
    %222 = vector.broadcast %cst_67 : f32 to vector<10x1xf32>
    %223 = arith.divf %221, %222 : vector<10x1xf32>
    %224 = vector.broadcast %223 : vector<10x1xf32> to vector<10x32xf32>
    %225 = arith.subf %219, %224 : vector<10x32xf32>
    %226 = arith.mulf %225, %225 : vector<10x32xf32>
    %cst_68 = arith.constant dense<0.000000e+00> : vector<10xf32>
    %227 = vector.multi_reduction <add>, %226, %cst_68 [1] : vector<10x32xf32> to vector<10xf32>
    %228 = vector.shape_cast %227 : vector<10xf32> to vector<10x1xf32>
    %cst_69 = arith.constant 3.200000e+01 : f32
    %229 = vector.broadcast %cst_69 : f32 to vector<10x1xf32>
    %230 = arith.divf %228, %229 : vector<10x1xf32>
    %cst_70 = arith.constant 9.99999974E-6 : f32
    %231 = vector.broadcast %cst_70 : f32 to vector<10x1xf32>
    %232 = arith.addf %230, %231 : vector<10x1xf32>
    %233 = math.rsqrt %232 : vector<10x1xf32>
    %234 = vector.broadcast %233 : vector<10x1xf32> to vector<10x32xf32>
    %235 = arith.mulf %225, %234 : vector<10x32xf32>
    %236 = vector.broadcast %146 : vector<1x32xf32> to vector<10x32xf32>
    %237 = arith.mulf %235, %236 : vector<10x32xf32>
    %238 = vector.broadcast %147 : vector<1x32xf32> to vector<10x32xf32>
    %239 = arith.addf %237, %238 : vector<10x32xf32>
    %c480 = arith.constant 480 : index
    %c0_71 = arith.constant 0 : index
    %240 = vector.load %arg1[%c480, %c0_71] : memref<640x128xbf16, #tpu.memory_space<vmem>>, vector<32x128xbf16>
    %241 = arith.truncf %239 : vector<10x32xf32> to vector<10x32xbf16>
    %cst_72 = arith.constant dense<0.000000e+00> : vector<10x128xf32>
    %242 = tpu.matmul %241, %240, %cst_72 {dimension_numbers = #tpu.dot_dimension_numbers<[1], [0], [0], [1], [0, 0, 1, 1], [], []>} : vector<10x32xbf16>, vector<32x128xbf16>, vector<10x128xf32> -> vector<10x128xf32>
    %243 = vector.broadcast %150 : vector<1x128xf32> to vector<10x128xf32>
    %244 = arith.addf %242, %243 : vector<10x128xf32>
    %cst_73 = arith.constant 1.702000e+00 : f32
    %245 = vector.broadcast %cst_73 : f32 to vector<10x128xf32>
    %246 = arith.mulf %245, %244 : vector<10x128xf32>
    %247 = arith.negf %246 : vector<10x128xf32>
    %248 = math.exp %247 : vector<10x128xf32>
    %cst_74 = arith.constant 1.000000e+00 : f32
    %249 = vector.broadcast %cst_74 : f32 to vector<10x128xf32>
    %250 = arith.addf %249, %248 : vector<10x128xf32>
    %251 = arith.divf %249, %250 : vector<10x128xf32>
    %252 = arith.mulf %244, %251 : vector<10x128xf32>
    %c512 = arith.constant 512 : index
    %c0_75 = arith.constant 0 : index
    %253 = vector.load %arg1[%c512, %c0_75] : memref<640x128xbf16, #tpu.memory_space<vmem>>, vector<128x32xbf16>
    %254 = arith.truncf %252 : vector<10x128xf32> to vector<10x128xbf16>
    %cst_76 = arith.constant dense<0.000000e+00> : vector<10x32xf32>
    %255 = tpu.matmul %254, %253, %cst_76 {dimension_numbers = #tpu.dot_dimension_numbers<[1], [0], [0], [1], [0, 0, 1, 1], [], []>} : vector<10x128xbf16>, vector<128x32xbf16>, vector<10x32xf32> -> vector<10x32xf32>
    %256 = vector.broadcast %151 : vector<1x32xf32> to vector<10x32xf32>
    %257 = arith.addf %255, %256 : vector<10x32xf32>
    %258 = arith.addf %219, %257 : vector<10x32xf32>
    %259 = vector.extract_strided_slice %258 {offsets = [0, 0], sizes = [1, 32], strides = [1, 1]} : vector<10x32xf32> to vector<1x32xf32>
    %260 = vector.extract_strided_slice %258 {offsets = [5, 0], sizes = [1, 32], strides = [1, 1]} : vector<10x32xf32> to vector<1x32xf32>
    %261 = tpu.concatenate %259, %260 in 0 : vector<1x32xf32>, vector<1x32xf32> -> vector<2x32xf32>
    %c100 = arith.constant 100 : index
    %c0_77 = arith.constant 0 : index
    %262 = vector.load %arg2[%c100, %c0_77] : memref<120x128xf32, #tpu.memory_space<vmem>>, vector<1x32xf32>
    %c101 = arith.constant 101 : index
    %c0_78 = arith.constant 0 : index
    %263 = vector.load %arg2[%c101, %c0_78] : memref<120x128xf32, #tpu.memory_space<vmem>>, vector<1x32xf32>
    %cst_79 = arith.constant dense<0.000000e+00> : vector<2xf32>
    %264 = vector.multi_reduction <add>, %261, %cst_79 [1] : vector<2x32xf32> to vector<2xf32>
    %265 = vector.shape_cast %264 : vector<2xf32> to vector<2x1xf32>
    %cst_80 = arith.constant 3.200000e+01 : f32
    %266 = vector.broadcast %cst_80 : f32 to vector<2x1xf32>
    %267 = arith.divf %265, %266 : vector<2x1xf32>
    %268 = vector.broadcast %267 : vector<2x1xf32> to vector<2x32xf32>
    %269 = arith.subf %261, %268 : vector<2x32xf32>
    %270 = arith.mulf %269, %269 : vector<2x32xf32>
    %cst_81 = arith.constant dense<0.000000e+00> : vector<2xf32>
    %271 = vector.multi_reduction <add>, %270, %cst_81 [1] : vector<2x32xf32> to vector<2xf32>
    %272 = vector.shape_cast %271 : vector<2xf32> to vector<2x1xf32>
    %cst_82 = arith.constant 3.200000e+01 : f32
    %273 = vector.broadcast %cst_82 : f32 to vector<2x1xf32>
    %274 = arith.divf %272, %273 : vector<2x1xf32>
    %cst_83 = arith.constant 9.99999974E-6 : f32
    %275 = vector.broadcast %cst_83 : f32 to vector<2x1xf32>
    %276 = arith.addf %274, %275 : vector<2x1xf32>
    %277 = math.rsqrt %276 : vector<2x1xf32>
    %278 = vector.broadcast %277 : vector<2x1xf32> to vector<2x32xf32>
    %279 = arith.mulf %269, %278 : vector<2x32xf32>
    %280 = vector.broadcast %262 : vector<1x32xf32> to vector<2x32xf32>
    %281 = arith.mulf %279, %280 : vector<2x32xf32>
    %282 = vector.broadcast %263 : vector<1x32xf32> to vector<2x32xf32>
    %283 = arith.addf %281, %282 : vector<2x32xf32>
    %c40 = arith.constant 40 : index
    %c0_84 = arith.constant 0 : index
    %284 = vector.load %arg2[%c40, %c0_84] : memref<120x128xf32, #tpu.memory_space<vmem>>, vector<32x16xf32>
    %cst_85 = arith.constant dense<0.000000e+00> : vector<2x16xf32>
    %285 = tpu.matmul %283, %284, %cst_85 {dimension_numbers = #tpu.dot_dimension_numbers<[1], [0], [0], [1], [0, 0, 1, 1], [], []>} : vector<2x32xf32>, vector<32x16xf32>, vector<2x16xf32> -> vector<2x16xf32>
    %286 = arith.mulf %285, %285 : vector<2x16xf32>
    %cst_86 = arith.constant dense<0.000000e+00> : vector<2xf32>
    %287 = vector.multi_reduction <add>, %286, %cst_86 [1] : vector<2x16xf32> to vector<2xf32>
    %288 = vector.shape_cast %287 : vector<2xf32> to vector<2x1xf32>
    %cst_87 = arith.constant 9.99999996E-13 : f32
    %289 = vector.broadcast %cst_87 : f32 to vector<2x1xf32>
    %290 = arith.addf %288, %289 : vector<2x1xf32>
    %291 = math.rsqrt %290 : vector<2x1xf32>
    %292 = vector.broadcast %291 : vector<2x1xf32> to vector<2x16xf32>
    %293 = arith.mulf %285, %292 : vector<2x16xf32>
    %c72 = arith.constant 72 : index
    %c0_88 = arith.constant 0 : index
    %294 = vector.load %arg2[%c72, %c0_88] : memref<120x128xf32, #tpu.memory_space<vmem>>, vector<16x2xf32>
    %cst_89 = arith.constant dense<0.000000e+00> : vector<2x2xf32>
    %295 = tpu.matmul %293, %294, %cst_89 {dimension_numbers = #tpu.dot_dimension_numbers<[1], [0], [0], [1], [0, 0, 1, 1], [], []>} : vector<2x16xf32>, vector<16x2xf32>, vector<2x2xf32> -> vector<2x2xf32>
    %c0_90 = arith.constant 0 : index
    %c0_91 = arith.constant 0 : index
    %296 = vector.load %arg3[%c0_90, %c0_91] : memref<2x2xf32, #tpu.memory_space<vmem>>, vector<2x2xf32>
    tpu.vector_store %arg3[%c0_90, %c0_91], %295 {strides = array<i32>} : memref<2x2xf32, #tpu.memory_space<vmem>>, vector<2x2xf32>,
    return
  }
}

</mosaic_0001>

<bundles_post_ra>
// kernel: clip_sim_model_infer.1
= control target key start
LH: loop header
LB: loop body
LE: loop exit
PB: predicated region body
PF: predicated region fallthrough
CT: control target
= control target key end

     0   :  { %v2357_v1 = vmov 0   ;;  %vm127_vm0 = vcmask 523264   ;;  %s2930_s0 = inlined_call_operand.vmem [shape: f32[10,192], index: 0, kind: input, shape index: {}]   ;;  %s2931_s1 = inlined_call_operand.vmem [shape: bf16[640,128], index: 1, kind: input, shape index: {}]   ;;  %s2932_s2 = inlined_call_operand.vmem [shape: f32[120,128], index: 2, kind: input, shape index: {}]   ;;  %s2933_s3 = inlined_call_operand.hbm [shape: f32[2,2], index: 3, kind: output, shape index: {}]  }
   0x1   :  { %v2213_v0 = vld [vmem:[%s2931_s1] sm:$0xff]   ;;  %131 = vmatprep.subr.bf16.mxu0 %v2357_v1  ;;  %v2214_v2 = vld [vmem:[%s2931_s1 + $0x8] sm:$0xff]   ;;  %v2215_v3 = vld [vmem:[%s2931_s1 + $0x10] sm:$0xff]  }
   0x2   :  { %132 = vmatpush1.bf16.msra.mxu0 %v2213_v0  ;;  %v2216_v4 = vld [vmem:[%s2931_s1 + $0x18] sm:$0xff]   ;;  %v26_v5 = vld [vmem:[%s2930_s0 + $0x8] sm:$0xff]  ;;  %v2217_v7 = vld [vmem:[%s2931_s1 + $0x20] sm:$0xff]  }
   0x3   :  { %133 = vmatprep.subr.bf16.mxu0 %v2357_v1  ;;  %v28_v6 = vld [vmem:[%s2930_s0 + $0x18] sm:$0x3]  ;;  %v2218_v9 = vld [vmem:[%s2931_s1 + $0x28] sm:$0xff]   ;;  %v2219_v10 = vld [vmem:[%s2931_s1 + $0x30] sm:$0xff]  }
   0x4   :  { %v54_v8 = vpack.c.bf16 %v28_v6, %v26_v5  ;;  %v2220_v11 = vld [vmem:[%s2931_s1 + $0x38] sm:$0xff]   ;;  %v2221_v12 = vld [vmem:[%s2931_s1 + $0x40] sm:$0xff]  }
   0x6   :  { %134 = vmatpush1.bf16.msra.mxu0 %v2214_v2  ;;  %1832 = vmatprep.mubr.msk.bf16.mxu0 %vm127_vm0, %v54_v8 }
   0x7   :  { %135 = vmatprep.subr.bf16.mxu0 %v2357_v1 }
   0xa   :  { %136 = vmatpush1.bf16.msra.mxu0 %v2215_v3 }
   0xb   :  { %137 = vmatprep.subr.bf16.mxu0 %v2357_v1 }
   0xe   :  { %138 = vmatpush1.bf16.msra.mxu0 %v2216_v4 }
   0xf   :  { %139 = vmatprep.subr.bf16.mxu0 %v2357_v1 }
  0x12   :  { %140 = vmatpush1.bf16.msra.mxu0 %v2217_v7 }
  0x13   :  { %141 = vmatprep.subr.bf16.mxu0 %v2357_v1 }
  0x16   :  { %142 = vmatpush1.bf16.msra.mxu0 %v2218_v9 }
  0x17   :  { %143 = vmatprep.subr.bf16.mxu0 %v2357_v1 }
  0x1a   :  { %144 = vmatpush1.bf16.msra.mxu0 %v2219_v10 }
  0x1b   :  { %145 = vmatprep.subr.bf16.mxu0 %v2357_v1 }
  0x1e   :  { %146 = vmatpush1.bf16.msra.mxu0 %v2220_v11 }
  0x1f   :  { %147 = vmatprep.subr.bf16.mxu0 %v2357_v1 }
  0x20   :  { %8 = vsyncpa [#allocation3], 0  ;;  %v2222_v13 = vld [vmem:[%s2931_s1 + $0x48] sm:$0xff]   ;;  %v2223_v14 = vld [vmem:[%s2931_s1 + $0x50] sm:$0xff]   ;;  %vm172_vm1 = vcmask 261120   ;;  %vm176_vm2 = vcmask 254976  }
  0x21   :  { %v2224_v15 = vld [vmem:[%s2931_s1 + $0x58] sm:$0xff]   ;;  %v25_v16 = vld [vmem:[%s2930_s0] sm:$0xff]  ;;  %v27_v17 = vld [vmem:[%s2930_s0 + $0x10] sm:$0x3]  ;;  %v2358_v4 = vmov 0.0   ;;  %vm2359_vm3 = vmmov 0  }
  0x22   :  { %148 = vmatpush1.bf16.msra.mxu0 %v2221_v12  ;;  %v53_v18 = vpack.c.bf16 %v27_v17, %v25_v16  ;;  %v21_v19 = vld [vmem:[%s2932_s2 + $0x58] sm:$0xff]  ;;  %v22_v21 = vld [vmem:[%s2932_s2 + $0x60] sm:$0x3]  ;;  %v1833_v46 = vld [vmem:[%s2932_s2 + $0x62] ss:$0 sm:$0xff]  ;;  %1981 = vmatprep.subr.bf16.mxu1 %v2358_v4  ;;  %vm326_vm4 = vcmask 1041408  }
  0x23   :  { %149 = vmatprep.subr.bf16.mxu0 %v2357_v1  ;;  %v1834_v48 = vld [vmem:[%s2932_s2 + $0x63] ss:$0 sm:$0xff]  ;;  %v2226_v5 = vld [vmem:[%s2931_s1 + $0x68] sm:$0xff]   ;;  %1987 = vmatprep.mubr.msk.bf16.mxu1 %vm2359_vm3, %v2358_v4  ;;  %vm346_vm5 = vcmask 1045504   ;;  %vm336_vm6 = vcmask 1043456   ;;  %s2360_s7 = smov 120  }
  0x24   :  { %v2225_v3 = vld [vmem:[%s2931_s1 + $0x60] sm:$0xff]   ;;  %s2361_s8 = smov 104   ;;  %s2362_s9 = smov 112   ;;  %vm371_vm7 = vcmask 64512   ;;  %vm446_vm8 = vcmask 326656   ;;  %vm614_vm9 = vcmask 130048  }
  0x25   :  { %s2363_s10 = smov 96   ;;  %s2364_s0 = smov 64   ;;  %vm617_vm10 = vcmask 195584   ;;  %vm1617_vm11 = vcmask 1040384   ;;  %vm1722_vm12 = vcmask 123904   ;;  %vm1804_vm13 = vcmask 9216  }
  0x26   :  { %150 = vmatpush1.bf16.msra.mxu0 %v2222_v13  ;;  %s2365_s25 = smov 8   ;;  %s2366_s26 = smov 16  }
  0x27   :  { %151 = vmatprep.subr.bf16.mxu0 %v2357_v1  ;;  %s2367_s27 = smov 24   ;;  %s2369_s18 = smov [#allocation2]  }
  0x28   :  { %s1812_s19 = sshll.u32 %s2369_s18, 4  ;;  %s1813_s19 = int_to_ptr.vmem [resolvable:$true] %s1812_s19 }
  0x29   :  { %s2333_s20 = scalar_lea.vmem %s1813_s19, 32  ;;  %p2338_p1 = scmp.lt.s32.totalorder %s1813_s19, %s1813_s19 }
  0x2a   :  { %152 = vmatpush1.bf16.msra.mxu0 %v2223_v14  ;;  %v1835_v14 = vld [vmem:[%s2932_s2 + $0x66] ss:$0 sm:$0xff]  ;;  %p2334_p0 = scmp.ne.s32.totalorder %s1813_s19, %s2333_s20  ;;  %p2339_p2 = scmp.lt.s32.totalorder %s2333_s20, %s2333_s20 }
  0x2b   :  { %153 = vmatprep.subr.bf16.mxu0 %v2357_v1 }
  0x2c   :  { %p2340_p3 = por %p2339_p2, %p2338_p1 }
  0x2e   :  { %154 = vmatpush1.bf16.msra.mxu0 %v2224_v15  ;;  %p2341_p4 = pnand %p2340_p3, %p2334_p0 }
  0x2f   :  { %1973 = vmatprep.subr.bf16.mxu0 %v2358_v4 }
  0x31   :  { %164 = vmatmul.mubr.bf16.vlgmr.msra.gmra.mrb[0].mxu0 %v53_v18  ;;  %v1836_v18 = vld [vmem:[%s2932_s2 + $0x67] ss:$0 sm:$0xff] }
  0x32   :  { %1974 = vmatpush3.bf16.msra.mxu0 %v2225_v3  ;;  %1977 = vmatprep.mubr.msk.bf16.mxu0 %vm2359_vm3, %v2358_v4 }
  0x33   :  { %1975 = vmatprep.subr.bf16.mxu0 %v2358_v4 }
  0x36   :  { %1976 = vmatpush3.bf16.msra.mxu0 %v2226_v5 }
  0x37   :  { %2017 = vmatprep.subr.bf16.mxu0 %v2358_v4 }
 0x104   :  { %v165_v20 = vpop.f32.mrb[0].mxu0 }
 0x105   :  { %v166_v22 = vadd.f32 %v165_v20, %v21_v19  ;;  %v167_v23 = vpop.f32.mrb[1].mxu0 }
 0x106   :  { %v168_v24 = vpop.f32.mrb[2].mxu0  ;;  %v1837_v23 = vld [vmem:[%s2932_s2 + $0x6a] ss:$0 sm:$0xff] }
 0x107   :  { %v169_v25 = vadd.f32 %v168_v24, %v22_v21  ;;  %v170_v26 = vpop.f32.mrb[3].mxu0  ;;  %v173_v27 = vsel %vm172_vm1, %v166_v22, 0.0 }
 0x108   :  { %174 = vadd.xlane.f32.xlu0 %v173_v27 }
 0x109   :  { %v177_v28 = vsel %vm176_vm2, %v169_v25, 0.0 }
 0x10c   :  { %178 = vadd.xlane.f32.xlu0 %v177_v28 }
 0x195   :  { %v175_v29 = vpop.xlane.xlu0 %174 }
 0x196   :  { %v181_v30 = vmul.f32 0.03125, %v175_v29 }
 0x198   :  { %v183_v31 = vsub.f32 %v166_v22, %v181_v30 }
 0x199   :  { %v179_v32 = vpop.xlane.xlu0 %178 }
 0x19a   :  { %v182_v33 = vmul.f32 0.03125, %v179_v32  ;;  %v185_v34 = vmul.f32 %v183_v31, %v183_v31 }
 0x19c   :  { %v184_v35 = vsub.f32 %v169_v25, %v182_v33  ;;  %v187_v36 = vsel %vm172_vm1, %v185_v34, 0.0 }
 0x19d   :  { %188 = vadd.xlane.f32.xlu1 %v187_v36 }
 0x19e   :  { %v186_v37 = vmul.f32 %v184_v35, %v184_v35 }
 0x1a0   :  { %v190_v38 = vsel %vm176_vm2, %v186_v37, 0.0 }
 0x1a1   :  { %191 = vadd.xlane.f32.xlu1 %v190_v38 }
 0x22a   :  { %v189_v39 = vpop.xlane.xlu1 %188 }
 0x22b   :  { %v193_v40 = vmul.f32 0.03125, %v189_v39 }
 0x22d   :  { %v195_v41 = vadd.f32 1e-05, %v193_v40 }
 0x22e   :  { %v192_v42 = vpop.xlane.xlu1 %191 }
 0x22f   :  { %2253 = vrsqrt.f32 %v195_v41  ;;  %v194_v43 = vmul.f32 0.03125, %v192_v42 }
 0x231   :  { %v196_v44 = vadd.f32 1e-05, %v194_v43 }
 0x233   :  { %2255 = vrsqrt.f32 %v196_v44 }
 0x239   :  { %v2254_v45 = vpop.eup %2253 }
 0x23a   :  { %v199_v47 = vmul.f32 %v2254_v45, %v183_v31 }
 0x23c   :  { %v205_v49 = vmul.f32 %v1833_v46, %v199_v47 }
 0x23d   :  { %v2256_v50 = vpop.eup %2255 }
 0x23e   :  { %v2454_v51 = vadd.f32 %v1834_v48, %v205_v49  ;;  %v200_v52 = vmul.f32 %v2256_v50, %v184_v35 }
 0x240   :  { %v221_v53 = vsel %vm172_vm1, %v2454_v51, 0.0  ;;  %v206_v54 = vmul.f32 %v1833_v46, %v200_v52 }
 0x241   :  { %222 = vadd.xlane.f32.xlu0 %v221_v53 }
 0x242   :  { %v2458_v55 = vadd.f32 %v1834_v48, %v206_v54 }
 0x244   :  { %v224_v56 = vsel %vm176_vm2, %v2458_v55, 0.0 }
 0x245   :  { %225 = vadd.xlane.f32.xlu1 %v224_v56 }
 0x2ce   :  { %v223_v57 = vpop.xlane.xlu0 %222 }
 0x2cf   :  { %v227_v58 = vmul.f32 0.03125, %v223_v57 }
 0x2d1   :  { %v229_v59 = vsub.f32 %v2454_v51, %v227_v58 }
 0x2d2   :  { %v226_v60 = vpop.xlane.xlu1 %225 }
 0x2d3   :  { %v228_v61 = vmul.f32 0.03125, %v226_v60  ;;  %v231_v62 = vmul.f32 %v229_v59, %v229_v59 }
 0x2d5   :  { %v230_v63 = vsub.f32 %v2458_v55, %v228_v61  ;;  %v233_v0 = vsel %vm172_vm1, %v231_v62, 0.0  ;;  %v2536_v61 = vld [vmem:[%s2932_s2] sm:$0xff] }
 0x2d6   :  { %234 = vadd.xlane.f32.xlu0 %v233_v0 }
 0x2d7   :  { %v232_v1 = vmul.f32 %v230_v63, %v230_v63 }
 0x2d9   :  { %v236_v2 = vsel %vm176_vm2, %v232_v1, 0.0 }
 0x2da   :  { %237 = vadd.xlane.f32.xlu1 %v236_v2 }
 0x363   :  { %v235_v6 = vpop.xlane.xlu0 %234 }
 0x364   :  { %v239_v7 = vmul.f32 0.03125, %v235_v6 }
 0x366   :  { %v241_v8 = vadd.f32 1e-05, %v239_v7 }
 0x367   :  { %v238_v9 = vpop.xlane.xlu1 %237 }
 0x368   :  { %2257 = vrsqrt.f32 %v241_v8  ;;  %v240_v10 = vmul.f32 0.03125, %v238_v9  ;;  %v2550_v8 = vld [vmem:[%s2932_s2 + $0x10] sm:$0xff] }
 0x36a   :  { %v242_v11 = vadd.f32 1e-05, %v240_v10  ;;  %v2555_v10 = vld [vmem:[%s2932_s2 + $0x18] sm:$0xff] }
 0x36c   :  { %2259 = vrsqrt.f32 %v242_v11 }
 0x372   :  { %v2258_v12 = vpop.eup %2257 }
 0x373   :  { %v245_v13 = vmul.f32 %v2258_v12, %v229_v59 }
 0x375   :  { %v251_v16 = vmul.f32 %v1835_v14, %v245_v13 }
 0x376   :  { %v2260_v15 = vpop.eup %2259 }
 0x377   :  { %v246_v17 = vmul.f32 %v2260_v15, %v230_v63  ;;  %v257_v20 = vadd.f32 %v1836_v18, %v251_v16  ;;  %v2541_v63 = vld [vmem:[%s2932_s2 + $0x8] sm:$0xff] }
 0x379   :  { %v252_v19 = vmul.f32 %v1835_v14, %v246_v17  ;;  %v2563_v17 = vld [vmem:[%s2932_s2 + $0x20] sm:$0xff] }
 0x37b   :  { %v258_v21 = vadd.f32 %v1836_v18, %v252_v19 }
 0x37d   :  { %v263_v22 = vpack.c.bf16 %v258_v21, %v257_v20 }
 0x37f   :  { %1978 = vmatmul.mubr.msk.bf16.vlgmr.msra.gmra.mrb[4].mxu0 %vm172_vm1, %v263_v22 }
 0x380   :  { %2021 = vmatprep.mubr.msk.bf16.mxu0 %vm2359_vm3, %v2358_v4 }
 0x452   :  { %v317_v24 = vpop.f32.mrb[4].mxu0 }
 0x453   :  { %v318_v25 = vadd.f32 %v1837_v23, %v317_v24  ;;  %v1979_v26 = vpop.f32.mrb[5].mxu0 }
 0x454   :  { %v320_v27 = vpop.f32.mrb[6].mxu0 }
 0x455   :  { %v321_v28 = vadd.f32 %v1837_v23, %v320_v27  ;;  %v1980_v29 = vpop.f32.mrb[7].mxu0  ;;  %v327_v30 = vrot.slane %v318_v25, 6  ;;  %v347_v31 = vrot.slane %v318_v25, 2  ;;  %v337_v35 = vrot.slane %v318_v25, 4 }
 0x457   :  { %v338_v32 = vrot.slane %v321_v28, 4  ;;  %330 = vrot.lane.b32.xlu0 %v327_v30, %s2360_s7  ;;  %v328_v33 = vrot.slane %v321_v28, 6  ;;  %v348_v34 = vrot.slane %v321_v28, 2 }
 0x459   :  { %v329_v36 = vsel %vm326_vm4, %v327_v30, %v328_v33  ;;  %v349_v37 = vsel %vm346_vm5, %v347_v31, %v348_v34  ;;  %v339_v38 = vsel %vm336_vm6, %v337_v35, %v338_v32 }
 0x45a   :  { %332 = vrot.lane.b32.xlu1 %v329_v36, %s2360_s7  ;;  %v2173_v39 = vpack.i.bf16 %v339_v38, %v337_v35 }
 0x45b   :  { %352 = vrot.lane.b32.xlu0 %v349_v37, %s2361_s8 }
 0x45e   :  { %2174 = vrot.lane.b32.xlu1 %v2173_v39, %s2362_s9 }
 0x462   :  { %350 = vrot.lane.b32.xlu1 %v347_v31, %s2361_s8 }
 0x4c9   :  { %v331_v40 = vpop.permute.xlu0 %330 }
 0x4ca   :  { %v356_v41 = vsel %vm326_vm4, %v321_v28, %v331_v40 }
 0x4cb   :  { %v2501_v42 = vpack.c.bf16 %v356_v41, %v318_v25 }
 0x4cc   :  { %v333_v43 = vpop.permute.xlu1 %332 }
 0x4cd   :  { %v353_v44 = vpop.permute.xlu0 %352  ;;  %365 = vrot.lane.b32.xlu1 %v2501_v42, %s2363_s10 }
 0x4ce   :  { %v2505_v45 = vpack.c.bf16 %v353_v44, %v353_v44 }
 0x4d0   :  { %v2175_v46 = vpop.permute.xlu1 %2174 }
 0x4d1   :  { %v2176_v47 = vunpack.i.l.bf16 %v2175_v46  ;;  %369 = vrot.lane.b32.xlu1 %v2505_v45, %s2363_s10  ;;  %v2177_v48 = vunpack.i.h.bf16 %v2175_v46 }
 0x4d3   :  { %v357_v50 = vsel %vm336_vm6, %v333_v43, %v2176_v47 }
 0x4d4   :  { %v351_v49 = vpop.permute.xlu1 %350 }
 0x4d5   :  { %v358_v52 = vsel %vm346_vm5, %v2177_v48, %v351_v49 }
 0x4d6   :  { %v2511_v53 = vpack.c.bf16 %v358_v52, %v357_v50 }
 0x4d8   :  { %367 = vrot.lane.b32.xlu0 %v2511_v53, %s2363_s10 }
 0x53f   :  { %v366_v54 = vpop.permute.xlu1 %365 }
 0x540   :  { %v382_v56 = vsel %vm371_vm7, %v366_v54, 0 }
 0x541   :  { %1982 = vmatpush3.bf16.xpose.msra.mxu1 %v382_v56 }
 0x542   :  { %1983 = vmatprep.subr.bf16.mxu1 %v2358_v4 }
 0x543   :  { %v370_v59 = vpop.permute.xlu1 %369 }
 0x544   :  { %v388_v60 = vsel %vm371_vm7, %v370_v59, 0 }
 0x54a   :  { %v368_v57 = vpop.permute.xlu0 %367 }
 0x54b   :  { %v385_v58 = vsel %vm371_vm7, %v368_v57, 0 }
 0x54c   :  { %1984 = vmatpush3.bf16.xpose.msra.mxu1 %v385_v58 }
 0x54d   :  { %1985 = vmatprep.subr.bf16.mxu1 %v2358_v4 }
 0x554   :  { %1986 = vmatpush3.bf16.xpose.msra.mxu1 %v388_v60 }
 0x555   :  { %1999 = vmatprep.subr.bf16.mxu1 %v2358_v4 }
 0x55b   :  { %1988 = vmatmul.mubr.msk.bf16.vlgmr.msra.gmra.mrb[0].mxu1 %vm371_vm7, %v2501_v42 }
 0x55c   :  { %1991 = vmatprep.mubr.msk.bf16.mxu1 %vm2359_vm3, %v2358_v4 }
 0x563   :  { %1992 = vmatmul.mubr.msk.bf16.gmra.mrb[4].mxu1 %vm371_vm7, %v2511_v53 }
 0x564   :  { %1995 = vmatprep.mubr.msk.bf16.mxu1 %vm2359_vm3, %v2358_v4 }
 0x56b   :  { %1996 = vmatmul.mubr.msk.bf16.gmra.mrb[8].mxu1 %vm371_vm7, %v2505_v45 }
 0x56c   :  { %2005 = vmatprep.mubr.msk.bf16.mxu1 %vm2359_vm3, %v2358_v4 }
 0x62e   :  { %v424_v62 = vpop.f32.mrb[0].mxu1 }
 0x62f   :  { %v425_v0 = vadd.f32 %v424_v62, %v2536_v61  ;;  %v1989_v1 = vpop.f32.mrb[1].mxu1 }
 0x630   :  { %v427_v2 = vpop.f32.mrb[2].mxu1 }
 0x631   :  { %v428_v3 = vadd.f32 %v427_v2, %v2541_v63  ;;  %v1990_v5 = vpop.f32.mrb[3].mxu1  ;;  %v447_v6 = vsel %vm446_vm8, %v425_v0, -inf }
 0x632   :  { %448 = vmax.xlane.f32.xlu0 %v447_v6 }
 0x633   :  { %v450_v7 = vsel %vm446_vm8, %v428_v3, -inf }
 0x634   :  { %451 = vmax.xlane.f32.xlu1 %v450_v7 }
 0x636   :  { %v432_v9 = vpop.f32.mrb[4].mxu1 }
 0x637   :  { %v433_v11 = vadd.f32 %v432_v9, %v2550_v8  ;;  %v1993_v12 = vpop.f32.mrb[5].mxu1 }
 0x638   :  { %v435_v13 = vpop.f32.mrb[6].mxu1 }
 0x639   :  { %v436_v14 = vadd.f32 %v435_v13, %v2555_v10  ;;  %v1994_v15 = vpop.f32.mrb[7].mxu1  ;;  %v453_v16 = vsel %vm446_vm8, %v433_v11, -inf }
 0x63a   :  { %454 = vmax.xlane.f32.xlu0 %v453_v16 }
 0x63b   :  { %v456_v18 = vsel %vm446_vm8, %v436_v14, -inf }
 0x63e   :  { %v440_v19 = vpop.f32.mrb[8].mxu1  ;;  %457 = vmax.xlane.f32.xlu0 %v456_v18 }
 0x63f   :  { %v441_v20 = vadd.f32 %v440_v19, %v2563_v17  ;;  %v1997_v21 = vpop.f32.mrb[9].mxu1 }
 0x640   :  { %v443_v22 = vpop.f32.mrb[10].mxu1 }
 0x641   :  { %v1998_v23 = vpop.f32.mrb[11].mxu1  ;;  %v459_v24 = vsel %vm446_vm8, %v441_v20, -inf }
 0x642   :  { %460 = vmax.xlane.f32.xlu0 %v459_v24 }
 0x6bf   :  { %v449_v25 = vpop.xlane.xlu0 %448 }
 0x6c0   :  { %v462_v26 = vsub.f32 %v425_v0, %v449_v25  ;;  %v2228_v25 = vld [vmem:[%s2931_s1 + $0x78] sm:$0xff]  }
 0x6c1   :  { %v452_v27 = vpop.xlane.xlu1 %451 }
 0x6c2   :  { %v467_v28 = vmul.f32 1.442695, %v462_v26  ;;  %v463_v29 = vsub.f32 %v428_v3, %v452_v27 }
 0x6c4   :  { %2261 = vpow2.f32 %v467_v28  ;;  %v469_v30 = vmul.f32 1.442695, %v463_v29 }
 0x6c6   :  { %2263 = vpow2.f32 %v469_v30 }
 0x6c7   :  { %v455_v31 = vpop.xlane.xlu0 %454 }
 0x6c8   :  { %v464_v32 = vsub.f32 %v433_v11, %v455_v31 }
 0x6ca   :  { %v471_v33 = vmul.f32 1.442695, %v464_v32 }
 0x6cb   :  { %v458_v34 = vpop.xlane.xlu0 %457 }
 0x6cc   :  { %2265 = vpow2.f32 %v471_v33  ;;  %v465_v35 = vsub.f32 %v436_v14, %v458_v34 }
 0x6ce   :  { %v2262_v36 = vpop.eup %2261  ;;  %v473_v37 = vmul.f32 1.442695, %v465_v35 }
 0x6cf   :  { %v477_v38 = vsel %vm446_vm8, %v2262_v36, 0.0  ;;  %v461_v47 = vpop.xlane.xlu0 %460 }
 0x6d0   :  { %v2264_v39 = vpop.eup %2263  ;;  %2267 = vpow2.f32 %v473_v37  ;;  %478 = vadd.xlane.f32.xlu1 %v477_v38  ;;  %v466_v48 = vsub.f32 %v441_v20, %v461_v47  ;;  %v2227_v20 = vld [vmem:[%s2931_s1 + $0x70] sm:$0xff]  }
 0x6d1   :  { %v480_v40 = vsel %vm446_vm8, %v2264_v39, 0.0  ;;  %2018 = vmatpush3.bf16.msra.mxu0 %v2227_v20 }
 0x6d2   :  { %481 = vadd.xlane.f32.xlu0 %v480_v40  ;;  %v475_v49 = vmul.f32 1.442695, %v466_v48  ;;  %2019 = vmatprep.subr.bf16.mxu0 %v2358_v4 }
 0x6d4   :  { %2269 = vpow2.f32 %v475_v49 }
 0x6d5   :  { %2020 = vmatpush3.bf16.msra.mxu0 %v2228_v25 }
 0x6d6   :  { %v2266_v41 = vpop.eup %2265  ;;  %2025 = vmatprep.subr.bf16.mxu0 %v2358_v4 }
 0x6d7   :  { %v483_v43 = vsel %vm446_vm8, %v2266_v41, 0.0 }
 0x6d8   :  { %484 = vadd.xlane.f32.xlu1 %v483_v43 }
 0x6da   :  { %v2268_v44 = vpop.eup %2267 }
 0x6db   :  { %v486_v46 = vsel %vm446_vm8, %v2268_v44, 0.0 }
 0x6dc   :  { %487 = vadd.xlane.f32.xlu0 %v486_v46 }
 0x6de   :  { %v2270_v50 = vpop.eup %2269 }
 0x6df   :  { %v489_v52 = vsel %vm446_vm8, %v2270_v50, 0.0 }
 0x6e9   :  { %507 = vrot.lane.b32.xlu1 %v2511_v53, %s2364_s0 }
 0x6f2   :  { %505 = vrot.lane.b32.xlu0 %v2501_v42, %s2364_s0 }
 0x70d   :  { %490 = vadd.xlane.f32.xlu1 %v489_v52 }
 0x71e   :  { %509 = vrot.lane.b32.xlu1 %v2505_v45, %s2364_s0 }
 0x75d   :  { %v479_v56 = vpop.xlane.xlu1 %478 }
 0x75f   :  { %v482_v54 = vpop.xlane.xlu0 %481 }
 0x760   :  { %2271 = vrcp.f32 %v482_v54 }
 0x761   :  { %2273 = vrcp.f32 %v479_v56 }
 0x765   :  { %v485_v58 = vpop.xlane.xlu1 %484 }
 0x769   :  { %v488_v57 = vpop.xlane.xlu0 %487  ;;  %v508_v42 = vpop.permute.xlu1 %507 }
 0x76a   :  { %2275 = vrcp.f32 %v488_v57  ;;  %v2272_v53 = vpop.eup %2271 }
 0x76b   :  { %2277 = vrcp.f32 %v485_v58  ;;  %v2274_v62 = vpop.eup %2273  ;;  %v498_v45 = vmul.f32 %v2272_v53, %v2264_v39 }
 0x76c   :  { %v497_v1 = vmul.f32 %v2274_v62, %v2262_v36  ;;  %v1847_v62 = vld [vmem:[%s2932_s2 + $0x6b] ss:$0 sm:$0xff] }
 0x76d   :  { %v506_v59 = vpop.permute.xlu0 %505 }
 0x76e   :  { %2000 = vmatpush3.bf16.msra.mxu1 %v506_v59  ;;  %v502_v3 = vpack.c.bf16 %v498_v45, %v497_v1 }
 0x76f   :  { %2001 = vmatprep.subr.bf16.mxu1 %v2358_v4 }
 0x772   :  { %2002 = vmatpush3.bf16.msra.mxu1 %v508_v42 }
 0x773   :  { %2003 = vmatprep.subr.bf16.mxu1 %v2358_v4 }
 0x774   :  { %v2276_v5 = vpop.eup %2275 }
 0x775   :  { %v2278_v6 = vpop.eup %2277  ;;  %v500_v7 = vmul.f32 %v2276_v5, %v2268_v44 }
 0x776   :  { %v499_v9 = vmul.f32 %v2278_v6, %v2266_v41 }
 0x778   :  { %v503_v11 = vpack.c.bf16 %v500_v7, %v499_v9 }
 0x79a   :  { %v491_v60 = vpop.xlane.xlu1 %490 }
 0x79b   :  { %2279 = vrcp.f32 %v491_v60 }
 0x79e   :  { %v510_v0 = vpop.permute.xlu1 %509 }
 0x79f   :  { %v523_v2 = vsel %vm336_vm6, %v510_v0, 0 }
 0x7a0   :  { %2004 = vmatpush3.bf16.msra.mxu1 %v523_v2 }
 0x7a1   :  { %2033 = vmatprep.subr.bf16.mxu1 %v2358_v4 }
 0x7a3   :  { %2006 = vmatmul.mubr.msk.bf16.vlgmr.msra.gmra.mrb[12].mxu1 %vm446_vm8, %v502_v3 }
 0x7a4   :  { %2009 = vmatprep.mubr.msk.bf16.mxu1 %vm2359_vm3, %v2358_v4 }
 0x7a5   :  { %v2280_v12 = vpop.eup %2279 }
 0x7a6   :  { %v501_v13 = vmul.f32 %v2280_v12, %v2270_v50 }
 0x7a8   :  { %v504_v14 = vpack.c.bf16 %v501_v13, %v501_v13 }
 0x7ab   :  { %2010 = vmatmul.mubr.msk.bf16.gmra.mrb[16].mxu1 %vm446_vm8, %v503_v11 }
 0x7ac   :  { %2013 = vmatprep.mubr.msk.bf16.mxu1 %vm2359_vm3, %v2358_v4 }
 0x7b3   :  { %2014 = vmatmul.mubr.msk.bf16.gmra.mrb[20].mxu1 %vm446_vm8, %v504_v14 }
 0x7b4   :  { %2049 = vmatprep.mubr.msk.bf16.mxu1 %vm2359_vm3, %v2358_v4 }
 0x876   :  { %v559_v15 = vpop.f32.mrb[12].mxu1 }
 0x877   :  { %v2007_v16 = vpop.f32.mrb[13].mxu1 }
 0x878   :  { %v562_v18 = vpop.f32.mrb[14].mxu1 }
 0x879   :  { %v2008_v19 = vpop.f32.mrb[15].mxu1  ;;  %v583_v22 = vrot.slane %v562_v18, 2 }
 0x87e   :  { %v567_v21 = vpop.f32.mrb[16].mxu1 }
 0x87f   :  { %v584_v23 = vrot.slane %v567_v21, 2  ;;  %v2011_v24 = vpop.f32.mrb[17].mxu1  ;;  %v593_v28 = vrot.slane %v567_v21, 4  ;;  %v2229_v21 = vld [vmem:[%s2931_s1 + $0x80] sm:$0xff]  }
 0x880   :  { %v570_v26 = vpop.f32.mrb[18].mxu1 }
 0x881   :  { %v585_v27 = vsel %vm346_vm5, %v583_v22, %v584_v23  ;;  %v594_v29 = vrot.slane %v570_v26, 4  ;;  %v2012_v30 = vpop.f32.mrb[19].mxu1  ;;  %v603_v35 = vrot.slane %v570_v26, 6  ;;  %v2230_v22 = vld [vmem:[%s2931_s1 + $0x88] sm:$0xff]  }
 0x882   :  { %v2178_v31 = vpack.i.bf16 %v584_v23, %v585_v27 }
 0x883   :  { %v595_v32 = vsel %vm336_vm6, %v593_v28, %v594_v29 }
 0x884   :  { %v2183_v33 = vpack.i.bf16 %v594_v29, %v595_v32  ;;  %2179 = vrot.lane.b32.xlu1 %v2178_v31, %s2365_s25  ;;  %v1851_v31 = vld [vmem:[%s2932_s2 + $0x68] ss:$0 sm:$0xff] }
 0x886   :  { %2184 = vrot.lane.b32.xlu0 %v2183_v33, %s2366_s26  ;;  %v575_v34 = vpop.f32.mrb[20].mxu1 }
 0x887   :  { %v604_v36 = vrot.slane %v575_v34, 6  ;;  %v2015_v37 = vpop.f32.mrb[21].mxu1 }
 0x888   :  { %v578_v38 = vpop.f32.mrb[22].mxu1 }
 0x889   :  { %v605_v39 = vsel %vm326_vm4, %v603_v35, %v604_v36  ;;  %v2016_v40 = vpop.f32.mrb[23].mxu1  ;;  %v1852_v35 = vld [vmem:[%s2932_s2 + $0x69] ss:$0 sm:$0xff] }
 0x88a   :  { %v2188_v41 = vpack.i.bf16 %v604_v36, %v605_v39  ;;  %v2231_v40 = vld [vmem:[%s2931_s1 + $0x90] sm:$0xff]  }
 0x88b   :  { %2034 = vmatpush3.bf16.msra.mxu1 %v2231_v40  ;;  %v1868_v40 = vld [vmem:[%s2932_s2 + $0x6e] ss:$0 sm:$0xff] }
 0x88c   :  { %2189 = vrot.lane.b32.xlu1 %v2188_v41, %s2367_s27  ;;  %2035 = vmatprep.subr.bf16.mxu1 %v2358_v4  ;;  %v2232_v41 = vld [vmem:[%s2931_s1 + $0x98] sm:$0xff]  }
 0x88f   :  { %2036 = vmatpush3.bf16.msra.mxu1 %v2232_v41 }
 0x890   :  { %2037 = vmatprep.subr.bf16.mxu1 %v2358_v4 }
 0x8f6   :  { %v2180_v43 = vpop.permute.xlu1 %2179 }
 0x8f7   :  { %v2182_v44 = vunpack.i.h.bf16 %v2180_v43  ;;  %v2181_v46 = vunpack.i.l.bf16 %v2180_v43  ;;  %v2233_v43 = vld [vmem:[%s2931_s1 + $0xa0] sm:$0xff]  }
 0x8f8   :  { %v2185_v47 = vpop.permute.xlu0 %2184  ;;  %2038 = vmatpush3.bf16.msra.mxu1 %v2233_v43 }
 0x8f9   :  { %v2187_v48 = vunpack.i.h.bf16 %v2185_v47  ;;  %v2186_v49 = vunpack.i.l.bf16 %v2185_v47  ;;  %v613_v50 = vsel %vm371_vm7, %v562_v18, %v2182_v44  ;;  %v612_v52 = vsel %vm371_vm7, %v559_v15, %v2181_v46  ;;  %2039 = vmatprep.subr.bf16.mxu1 %v2358_v4  ;;  %v2234_v44 = vld [vmem:[%s2931_s1 + $0xa8] sm:$0xff]   ;;  %v2235_v46 = vld [vmem:[%s2931_s1 + $0xb0] sm:$0xff]   ;;  %v2236_v47 = vld [vmem:[%s2931_s1 + $0xb8] sm:$0xff]  }
 0x8fb   :  { %v616_v58 = vsel %vm614_vm9, %v613_v50, %v2187_v48  ;;  %v615_v59 = vsel %vm614_vm9, %v612_v52, %v2186_v49  ;;  %v2237_v48 = vld [vmem:[%s2931_s1 + $0xc0] sm:$0xff]   ;;  %v2238_v49 = vld [vmem:[%s2931_s1 + $0xc8] sm:$0xff]  }
 0x8fc   :  { %2040 = vmatpush3.bf16.msra.mxu1 %v2234_v44  ;;  %v1853_v50 = vld [vmem:[%s2932_s2 + $0x6c] ss:$0 sm:$0xff] }
 0x8fd   :  { %2041 = vmatprep.subr.bf16.mxu1 %v2358_v4 }
 0x8fe   :  { %v2190_v54 = vpop.permute.xlu1 %2189 }
 0x8ff   :  { %v2192_v56 = vunpack.i.h.bf16 %v2190_v54  ;;  %v2191_v57 = vunpack.i.l.bf16 %v2190_v54 }
 0x900   :  { %2042 = vmatpush3.bf16.msra.mxu1 %v2235_v46 }
 0x901   :  { %v619_v42 = vsel %vm617_vm10, %v616_v58, %v2192_v56  ;;  %v618_v53 = vsel %vm617_vm10, %v615_v59, %v2191_v57  ;;  %2043 = vmatprep.subr.bf16.mxu1 %v2358_v4 }
 0x902   :  { %v624_v60 = vpack.c.bf16 %v619_v42, %v618_v53 }
 0x904   :  { %2022 = vmatmul.mubr.msk.bf16.vlgmr.msra.gmra.mrb[8].mxu0 %vm172_vm1, %v624_v60  ;;  %2044 = vmatpush3.bf16.msra.mxu1 %v2236_v47  ;;  %v1869_v47 = vld [vmem:[%s2932_s2 + $0x6f] ss:$0 sm:$0xff] }
 0x905   :  { %2029 = vmatprep.mubr.msk.bf16.mxu0 %vm2359_vm3, %v2358_v4  ;;  %2026 = vmatpush3.bf16.msra.mxu0 %v2229_v21 }
 0x906   :  { %2027 = vmatprep.subr.bf16.mxu0 %v2358_v4  ;;  %2045 = vmatprep.subr.bf16.mxu1 %v2358_v4 }
 0x908   :  { %2046 = vmatpush3.bf16.msra.mxu1 %v2237_v48 }
 0x909   :  { %2028 = vmatpush3.bf16.msra.mxu0 %v2230_v22  ;;  %2047 = vmatprep.subr.bf16.mxu1 %v2358_v4 }
 0x90a   :  { %2053 = vmatprep.subr.bf16.mxu0 %v2358_v4 }
 0x90c   :  { %2048 = vmatpush3.bf16.msra.mxu1 %v2238_v49 }
 0x90d   :  { %2079 = vmatprep.subr.bf16.mxu1 %v2358_v4 }
 0x9d7   :  { %v678_v45 = vpop.f32.mrb[8].mxu0 }
 0x9d8   :  { %v679_v0 = vadd.f32 %v1847_v62, %v678_v45  ;;  %v2023_v1 = vpop.f32.mrb[9].mxu0 }
 0x9d9   :  { %v681_v2 = vpop.f32.mrb[10].mxu0 }
 0x9da   :  { %v2619_v3 = vadd.f32 %v679_v0, %v2454_v51  ;;  %v682_v5 = vadd.f32 %v1847_v62, %v681_v2  ;;  %v2024_v6 = vpop.f32.mrb[11].mxu0 }
 0x9dc   :  { %v2622_v7 = vadd.f32 %v682_v5, %v2458_v55  ;;  %v687_v9 = vsel %vm172_vm1, %v2619_v3, 0.0 }
 0x9dd   :  { %688 = vadd.xlane.f32.xlu0 %v687_v9 }
 0x9de   :  { %v690_v11 = vsel %vm176_vm2, %v2622_v7, 0.0 }
 0x9df   :  { %691 = vadd.xlane.f32.xlu1 %v690_v11 }
 0xa6a   :  { %v689_v12 = vpop.xlane.xlu0 %688 }
 0xa6b   :  { %v693_v13 = vmul.f32 0.03125, %v689_v12 }
 0xa6c   :  { %v692_v14 = vpop.xlane.xlu1 %691 }
 0xa6d   :  { %v695_v15 = vsub.f32 %v2619_v3, %v693_v13  ;;  %v694_v51 = vmul.f32 0.03125, %v692_v14  ;;  %v1859_v13 = vld [vmem:[%s2932_s2 + $0x6d] ss:$0 sm:$0xff] }
 0xa6f   :  { %v696_v16 = vsub.f32 %v2622_v7, %v694_v51  ;;  %v697_v18 = vmul.f32 %v695_v15, %v695_v15 }
 0xa71   :  { %v699_v55 = vsel %vm172_vm1, %v697_v18, 0.0  ;;  %v698_v19 = vmul.f32 %v696_v16, %v696_v16 }
 0xa72   :  { %700 = vadd.xlane.f32.xlu0 %v699_v55 }
 0xa73   :  { %v702_v20 = vsel %vm176_vm2, %v698_v19, 0.0 }
 0xa76   :  { %703 = vadd.xlane.f32.xlu0 %v702_v20 }
 0xaff   :  { %v701_v23 = vpop.xlane.xlu0 %700 }
 0xb00   :  { %v705_v24 = vmul.f32 0.03125, %v701_v23 }
 0xb02   :  { %v707_v25 = vadd.f32 1e-05, %v705_v24 }
 0xb03   :  { %v704_v26 = vpop.xlane.xlu0 %703 }
 0xb04   :  { %2281 = vrsqrt.f32 %v707_v25  ;;  %v706_v27 = vmul.f32 0.03125, %v704_v26 }
 0xb06   :  { %v708_v28 = vadd.f32 1e-05, %v706_v27 }
 0xb08   :  { %2283 = vrsqrt.f32 %v708_v28 }
 0xb0e   :  { %v2282_v29 = vpop.eup %2281 }
 0xb0f   :  { %v711_v30 = vmul.f32 %v2282_v29, %v695_v15 }
 0xb11   :  { %v717_v33 = vmul.f32 %v1851_v31, %v711_v30 }
 0xb12   :  { %v2284_v32 = vpop.eup %2283 }
 0xb13   :  { %v712_v34 = vmul.f32 %v2284_v32, %v696_v16  ;;  %v723_v37 = vadd.f32 %v1852_v35, %v717_v33  ;;  %v2240_v32 = vld [vmem:[%s2931_s1 + $0xd8] sm:$0xff]  }
 0xb15   :  { %v718_v36 = vmul.f32 %v1851_v31, %v712_v34  ;;  %v2239_v31 = vld [vmem:[%s2931_s1 + $0xd0] sm:$0xff]  }
 0xb17   :  { %v724_v38 = vadd.f32 %v1852_v35, %v718_v36 }
 0xb19   :  { %v729_v39 = vpack.c.bf16 %v724_v38, %v723_v37 }
 0xb1b   :  { %2030 = vmatmul.mubr.msk.bf16.vlgmr.msra.gmra.mrb[12].mxu0 %vm172_vm1, %v729_v39 }
 0xb1c   :  { %2057 = vmatprep.mubr.msk.bf16.mxu0 %vm2359_vm3, %v2358_v4  ;;  %2054 = vmatpush3.bf16.msra.mxu0 %v2239_v31 }
 0xb1d   :  { %2055 = vmatprep.subr.bf16.mxu0 %v2358_v4 }
 0xb20   :  { %2056 = vmatpush3.bf16.msra.mxu0 %v2240_v32 }
 0xb21   :  { %2061 = vmatprep.subr.bf16.mxu0 %v2358_v4 }
 0xbee   :  { %v783_v52 = vpop.f32.mrb[12].mxu0 }
 0xbef   :  { %v784_v54 = vadd.f32 %v1853_v50, %v783_v52  ;;  %v2031_v56 = vpop.f32.mrb[13].mxu0 }
 0xbf0   :  { %v786_v57 = vpop.f32.mrb[14].mxu0 }
 0xbf1   :  { %v1857_v58 = vmul.f32 -1.702, %v784_v54  ;;  %v787_v59 = vadd.f32 %v1853_v50, %v786_v57  ;;  %v2032_v42 = vpop.f32.mrb[15].mxu0 }
 0xbf3   :  { %v794_v53 = vmul.f32 1.442695, %v1857_v58  ;;  %v1858_v60 = vmul.f32 -1.702, %v787_v59 }
 0xbf5   :  { %2285 = vpow2.f32 %v794_v53  ;;  %v796_v62 = vmul.f32 1.442695, %v1858_v60 }
 0xbf7   :  { %2287 = vpow2.f32 %v796_v62 }
 0xbff   :  { %v2286_v45 = vpop.eup %2285 }
 0xc00   :  { %v798_v0 = vadd.f32 1.0, %v2286_v45 }
 0xc01   :  { %v2288_v1 = vpop.eup %2287 }
 0xc02   :  { %2289 = vrcp.f32 %v798_v0  ;;  %v799_v2 = vadd.f32 1.0, %v2288_v1 }
 0xc04   :  { %2291 = vrcp.f32 %v799_v2 }
 0xc0c   :  { %v2290_v5 = vpop.eup %2289 }
 0xc0d   :  { %v804_v9 = vmul.f32 %v2290_v5, %v784_v54  ;;  %v1870_v54 = vld [vmem:[%s2932_s2 + $0x72] ss:$0 sm:$0xff] }
 0xc0e   :  { %v2292_v6 = vpop.eup %2291 }
 0xc0f   :  { %v805_v11 = vmul.f32 %v2292_v6, %v787_v59 }
 0xc11   :  { %v822_v12 = vpack.c.bf16 %v805_v11, %v804_v9 }
 0xc13   :  { %2050 = vmatmul.mubr.bf16.vlgmr.msra.gmra.mrb[24].mxu1 %v822_v12 }
 0xc14   :  { %2085 = vmatprep.mubr.msk.bf16.mxu1 %vm2359_vm3, %v2358_v4 }
 0xce6   :  { %v909_v14 = vpop.f32.mrb[24].mxu1 }
 0xce7   :  { %v910_v15 = vadd.f32 %v1859_v13, %v909_v14  ;;  %v2051_v51 = vpop.f32.mrb[25].mxu1 }
 0xce8   :  { %v912_v16 = vpop.f32.mrb[26].mxu1 }
 0xce9   :  { %v2690_v18 = vadd.f32 %v910_v15, %v2619_v3  ;;  %v913_v55 = vadd.f32 %v1859_v13, %v912_v16  ;;  %v2052_v19 = vpop.f32.mrb[27].mxu1 }
 0xceb   :  { %v2693_v20 = vadd.f32 %v913_v55, %v2622_v7  ;;  %v926_v21 = vsel %vm172_vm1, %v2690_v18, 0.0 }
 0xcec   :  { %927 = vadd.xlane.f32.xlu0 %v926_v21 }
 0xced   :  { %v929_v22 = vsel %vm176_vm2, %v2693_v20, 0.0 }
 0xcee   :  { %930 = vadd.xlane.f32.xlu1 %v929_v22 }
 0xd79   :  { %v928_v23 = vpop.xlane.xlu0 %927 }
 0xd7a   :  { %v932_v24 = vmul.f32 0.03125, %v928_v23 }
 0xd7b   :  { %v931_v25 = vpop.xlane.xlu1 %930 }
 0xd7c   :  { %v934_v26 = vsub.f32 %v2690_v18, %v932_v24  ;;  %v933_v3 = vmul.f32 0.03125, %v931_v25 }
 0xd7e   :  { %v935_v27 = vsub.f32 %v2693_v20, %v933_v3  ;;  %v936_v28 = vmul.f32 %v934_v26, %v934_v26 }
 0xd80   :  { %v938_v7 = vsel %vm172_vm1, %v936_v28, 0.0  ;;  %v937_v29 = vmul.f32 %v935_v27, %v935_v27 }
 0xd81   :  { %939 = vadd.xlane.f32.xlu0 %v938_v7 }
 0xd82   :  { %v941_v30 = vsel %vm176_vm2, %v937_v29, 0.0 }
 0xd83   :  { %942 = vadd.xlane.f32.xlu1 %v941_v30 }
 0xe0e   :  { %v940_v33 = vpop.xlane.xlu0 %939 }
 0xe0f   :  { %v944_v34 = vmul.f32 0.03125, %v940_v33 }
 0xe10   :  { %v943_v35 = vpop.xlane.xlu1 %942 }
 0xe11   :  { %v946_v36 = vadd.f32 1e-05, %v944_v34  ;;  %v945_v37 = vmul.f32 0.03125, %v943_v35 }
 0xe13   :  { %2293 = vrsqrt.f32 %v946_v36  ;;  %v947_v38 = vadd.f32 1e-05, %v945_v37 }
 0xe15   :  { %2295 = vrsqrt.f32 %v947_v38 }
 0xe1d   :  { %v2294_v39 = vpop.eup %2293 }
 0xe1e   :  { %v950_v41 = vmul.f32 %v2294_v39, %v934_v26 }
 0xe1f   :  { %v2296_v43 = vpop.eup %2295 }
 0xe20   :  { %v956_v44 = vmul.f32 %v1868_v40, %v950_v41  ;;  %v951_v46 = vmul.f32 %v2296_v43, %v935_v27 }
 0xe22   :  { %v957_v48 = vmul.f32 %v1868_v40, %v951_v46  ;;  %v962_v49 = vadd.f32 %v1869_v47, %v956_v44 }
 0xe24   :  { %v963_v50 = vadd.f32 %v1869_v47, %v957_v48 }
 0xe26   :  { %v968_v52 = vpack.c.bf16 %v963_v50, %v962_v49 }
 0xe28   :  { %2058 = vmatmul.mubr.msk.bf16.vlgmr.msra.gmra.mrb[16].mxu0 %vm172_vm1, %v968_v52 }
 0xe29   :  { %2067 = vmatprep.mubr.msk.bf16.mxu0 %vm2359_vm3, %v2358_v4 }
 0xefb   :  { %v1022_v56 = vpop.f32.mrb[16].mxu0 }
 0xefc   :  { %v1023_v57 = vadd.f32 %v1870_v54, %v1022_v56  ;;  %v2059_v58 = vpop.f32.mrb[17].mxu0 }
 0xefd   :  { %v1025_v59 = vpop.f32.mrb[18].mxu0 }
 0xefe   :  { %v1026_v42 = vadd.f32 %v1870_v54, %v1025_v59  ;;  %v2060_v53 = vpop.f32.mrb[19].mxu0  ;;  %v1031_v60 = vrot.slane %v1023_v57, 6  ;;  %v1049_v62 = vrot.slane %v1023_v57, 2  ;;  %v1040_v2 = vrot.slane %v1023_v57, 4 }
 0xf00   :  { %v1041_v45 = vrot.slane %v1026_v42, 4  ;;  %1034 = vrot.lane.b32.xlu0 %v1031_v60, %s2360_s7  ;;  %v1032_v0 = vrot.slane %v1026_v42, 6  ;;  %v1050_v1 = vrot.slane %v1026_v42, 2 }
 0xf02   :  { %v1033_v5 = vsel %vm326_vm4, %v1031_v60, %v1032_v0  ;;  %v1051_v6 = vsel %vm346_vm5, %v1049_v62, %v1050_v1  ;;  %v1042_v9 = vsel %vm336_vm6, %v1040_v2, %v1041_v45 }
 0xf03   :  { %1036 = vrot.lane.b32.xlu1 %v1033_v5, %s2360_s7  ;;  %v2193_v11 = vpack.i.bf16 %v1042_v9, %v1040_v2 }
 0xf04   :  { %1054 = vrot.lane.b32.xlu0 %v1051_v6, %s2361_s8 }
 0xf07   :  { %2194 = vrot.lane.b32.xlu1 %v2193_v11, %s2362_s9 }
 0xf0b   :  { %1052 = vrot.lane.b32.xlu1 %v1049_v62, %s2361_s8 }
 0xf72   :  { %v1035_v12 = vpop.permute.xlu0 %1034 }
 0xf73   :  { %v1058_v13 = vsel %vm326_vm4, %v1026_v42, %v1035_v12 }
 0xf74   :  { %v2732_v14 = vpack.c.bf16 %v1058_v13, %v1023_v57 }
 0xf75   :  { %v1037_v15 = vpop.permute.xlu1 %1036 }
 0xf76   :  { %v1055_v51 = vpop.permute.xlu0 %1054  ;;  %1067 = vrot.lane.b32.xlu1 %v2732_v14, %s2363_s10 }
 0xf77   :  { %v2736_v16 = vpack.c.bf16 %v1055_v51, %v1055_v51 }
 0xf79   :  { %v2195_v55 = vpop.permute.xlu1 %2194 }
 0xf7a   :  { %v2196_v19 = vunpack.i.l.bf16 %v2195_v55  ;;  %1071 = vrot.lane.b32.xlu1 %v2736_v16, %s2363_s10  ;;  %v2197_v21 = vunpack.i.h.bf16 %v2195_v55 }
 0xf7c   :  { %v1059_v23 = vsel %vm336_vm6, %v1037_v15, %v2196_v19 }
 0xf7d   :  { %v1053_v22 = vpop.permute.xlu1 %1052 }
 0xf7e   :  { %v1060_v24 = vsel %vm346_vm5, %v2197_v21, %v1053_v22 }
 0xf7f   :  { %v2742_v25 = vpack.c.bf16 %v1060_v24, %v1059_v23 }
 0xf81   :  { %1069 = vrot.lane.b32.xlu0 %v2742_v25, %s2363_s10 }
 0xfe8   :  { %v1068_v26 = vpop.permute.xlu1 %1067 }
 0xfe9   :  { %v1083_v3 = vsel %vm371_vm7, %v1068_v26, 0 }
 0xfea   :  { %2062 = vmatpush3.bf16.xpose.msra.mxu0 %v1083_v3 }
 0xfeb   :  { %2063 = vmatprep.subr.bf16.mxu0 %v2358_v4 }
 0xfec   :  { %v1072_v7 = vpop.permute.xlu1 %1071 }
 0xfed   :  { %v1089_v29 = vsel %vm371_vm7, %v1072_v7, 0 }
 0xff3   :  { %v1070_v27 = vpop.permute.xlu0 %1069 }
 0xff4   :  { %v1086_v28 = vsel %vm371_vm7, %v1070_v27, 0 }
 0xff5   :  { %2064 = vmatpush3.bf16.xpose.msra.mxu0 %v1086_v28 }
 0xff6   :  { %2065 = vmatprep.subr.bf16.mxu0 %v2358_v4 }
 0xffd   :  { %2066 = vmatpush3.bf16.xpose.msra.mxu0 %v1089_v29 }
 0xffe   :  { %2113 = vmatprep.subr.bf16.mxu0 %v2358_v4 }
0x1004   :  { %2068 = vmatmul.mubr.msk.bf16.vlgmr.msra.gmra.mrb[20].mxu0 %vm371_vm7, %v2732_v14 }
0x1005   :  { %2071 = vmatprep.mubr.msk.bf16.mxu0 %vm2359_vm3, %v2358_v4 }
0x100c   :  { %2072 = vmatmul.mubr.msk.bf16.gmra.mrb[24].mxu0 %vm371_vm7, %v2742_v25 }
0x100d   :  { %2075 = vmatprep.mubr.msk.bf16.mxu0 %vm2359_vm3, %v2358_v4 }
0x1014   :  { %2076 = vmatmul.mubr.msk.bf16.gmra.mrb[28].mxu0 %vm371_vm7, %v2736_v16 }
0x1015   :  { %2129 = vmatprep.mubr.msk.bf16.mxu0 %vm2359_vm3, %v2358_v4 }
0x10d7   :  { %v1125_v30 = vpop.f32.mrb[20].mxu0 }
0x10d8   :  { %v1126_v31 = vadd.f32 %v1125_v30, %v2536_v61  ;;  %v2069_v32 = vpop.f32.mrb[21].mxu0 }
0x10d9   :  { %v1128_v33 = vpop.f32.mrb[22].mxu0 }
0x10da   :  { %v1129_v34 = vadd.f32 %v1128_v33, %v2541_v63  ;;  %v2070_v35 = vpop.f32.mrb[23].mxu0  ;;  %v1147_v36 = vsel %vm446_vm8, %v1126_v31, -inf }
0x10db   :  { %1148 = vmax.xlane.f32.xlu0 %v1147_v36 }
0x10dc   :  { %v1150_v37 = vsel %vm446_vm8, %v1129_v34, -inf }
0x10dd   :  { %1151 = vmax.xlane.f32.xlu1 %v1150_v37 }
0x10df   :  { %v1133_v38 = vpop.f32.mrb[24].mxu0 }
0x10e0   :  { %v1134_v39 = vadd.f32 %v1133_v38, %v2550_v8  ;;  %v2073_v40 = vpop.f32.mrb[25].mxu0  ;;  %v2241_v38 = vld [vmem:[%s2931_s1 + $0xe0] sm:$0xff]  }
0x10e1   :  { %v1136_v41 = vpop.f32.mrb[26].mxu0 }
0x10e2   :  { %v1137_v43 = vadd.f32 %v1136_v41, %v2555_v10  ;;  %v2074_v44 = vpop.f32.mrb[27].mxu0  ;;  %v1153_v61 = vsel %vm446_vm8, %v1134_v39, -inf }
0x10e3   :  { %1154 = vmax.xlane.f32.xlu0 %v1153_v61  ;;  %v2242_v44 = vld [vmem:[%s2931_s1 + $0xe8] sm:$0xff]  }
0x10e4   :  { %v1156_v63 = vsel %vm446_vm8, %v1137_v43, -inf }
0x10e7   :  { %1157 = vmax.xlane.f32.xlu0 %v1156_v63  ;;  %v1141_v46 = vpop.f32.mrb[28].mxu0 }
0x10e8   :  { %v1142_v47 = vadd.f32 %v1141_v46, %v2563_v17  ;;  %v2077_v48 = vpop.f32.mrb[29].mxu0 }
0x10e9   :  { %v1144_v49 = vpop.f32.mrb[30].mxu0 }
0x10ea   :  { %v2078_v50 = vpop.f32.mrb[31].mxu0  ;;  %v1159_v52 = vsel %vm446_vm8, %v1142_v47, -inf }
0x10eb   :  { %1160 = vmax.xlane.f32.xlu0 %v1159_v52 }
0x1168   :  { %v1149_v8 = vpop.xlane.xlu0 %1148 }
0x1169   :  { %v1162_v54 = vsub.f32 %v1126_v31, %v1149_v8 }
0x116a   :  { %v1152_v56 = vpop.xlane.xlu1 %1151 }
0x116b   :  { %v1167_v10 = vmul.f32 1.442695, %v1162_v54  ;;  %v1163_v57 = vsub.f32 %v1129_v34, %v1152_v56 }
0x116d   :  { %2297 = vpow2.f32 %v1167_v10  ;;  %v1169_v58 = vmul.f32 1.442695, %v1163_v57 }
0x116f   :  { %2299 = vpow2.f32 %v1169_v58 }
0x1170   :  { %v1155_v59 = vpop.xlane.xlu0 %1154 }
0x1171   :  { %v1164_v42 = vsub.f32 %v1134_v39, %v1155_v59 }
0x1173   :  { %v1171_v53 = vmul.f32 1.442695, %v1164_v42 }
0x1174   :  { %v1158_v60 = vpop.xlane.xlu0 %1157 }
0x1175   :  { %2301 = vpow2.f32 %v1171_v53  ;;  %v1165_v17 = vsub.f32 %v1137_v43, %v1158_v60 }
0x1177   :  { %v2298_v62 = vpop.eup %2297  ;;  %v1173_v45 = vmul.f32 1.442695, %v1165_v17 }
0x1178   :  { %v1177_v0 = vsel %vm446_vm8, %v2298_v62, 0.0  ;;  %v1161_v12 = vpop.xlane.xlu0 %1160 }
0x1179   :  { %v2300_v1 = vpop.eup %2299  ;;  %2303 = vpow2.f32 %v1173_v45  ;;  %1178 = vadd.xlane.f32.xlu1 %v1177_v0  ;;  %v1166_v13 = vsub.f32 %v1142_v47, %v1161_v12 }
0x117a   :  { %v1180_v2 = vsel %vm446_vm8, %v2300_v1, 0.0 }
0x117b   :  { %1181 = vadd.xlane.f32.xlu0 %v1180_v2  ;;  %v1175_v15 = vmul.f32 1.442695, %v1166_v13 }
0x117d   :  { %2305 = vpow2.f32 %v1175_v15 }
0x117f   :  { %v2302_v5 = vpop.eup %2301 }
0x1180   :  { %v1183_v6 = vsel %vm446_vm8, %v2302_v5, 0.0 }
0x1181   :  { %1184 = vadd.xlane.f32.xlu1 %v1183_v6 }
0x1183   :  { %v2304_v9 = vpop.eup %2303 }
0x1184   :  { %v1186_v11 = vsel %vm446_vm8, %v2304_v9, 0.0 }
0x1185   :  { %1187 = vadd.xlane.f32.xlu0 %v1186_v11 }
0x1187   :  { %v2306_v51 = vpop.eup %2305 }
0x1188   :  { %v1189_v55 = vsel %vm446_vm8, %v2306_v51, 0.0 }
0x1192   :  { %1207 = vrot.lane.b32.xlu1 %v2742_v25, %s2364_s0 }
0x119b   :  { %1205 = vrot.lane.b32.xlu0 %v2732_v14, %s2364_s0 }
0x11b6   :  { %1190 = vadd.xlane.f32.xlu1 %v1189_v55 }
0x11c7   :  { %1209 = vrot.lane.b32.xlu1 %v2736_v16, %s2364_s0 }
0x1206   :  { %v1179_v21 = vpop.xlane.xlu1 %1178 }
0x1208   :  { %v1182_v19 = vpop.xlane.xlu0 %1181 }
0x1209   :  { %2307 = vrcp.f32 %v1182_v19 }
0x120a   :  { %2309 = vrcp.f32 %v1179_v21 }
0x120e   :  { %v1185_v23 = vpop.xlane.xlu1 %1184 }
0x1212   :  { %v1188_v22 = vpop.xlane.xlu0 %1187  ;;  %v1208_v14 = vpop.permute.xlu1 %1207 }
0x1213   :  { %2311 = vrcp.f32 %v1188_v22  ;;  %v2308_v25 = vpop.eup %2307 }
0x1214   :  { %2313 = vrcp.f32 %v1185_v23  ;;  %v2310_v3 = vpop.eup %2309  ;;  %v1198_v16 = vmul.f32 %v2308_v25, %v2300_v1  ;;  %v1880_v23 = vld [vmem:[%s2932_s2 + $0x73] ss:$0 sm:$0xff] }
0x1215   :  { %v1197_v28 = vmul.f32 %v2310_v3, %v2298_v62 }
0x1216   :  { %v1206_v24 = vpop.permute.xlu0 %1205 }
0x1217   :  { %2080 = vmatpush3.bf16.msra.mxu1 %v1206_v24  ;;  %v1202_v29 = vpack.c.bf16 %v1198_v16, %v1197_v28 }
0x1218   :  { %2081 = vmatprep.subr.bf16.mxu1 %v2358_v4 }
0x121b   :  { %2082 = vmatpush3.bf16.msra.mxu1 %v1208_v14 }
0x121c   :  { %2083 = vmatprep.subr.bf16.mxu1 %v2358_v4 }
0x121d   :  { %v2312_v30 = vpop.eup %2311 }
0x121e   :  { %v2314_v31 = vpop.eup %2313  ;;  %v1200_v32 = vmul.f32 %v2312_v30, %v2304_v9 }
0x121f   :  { %v1199_v33 = vmul.f32 %v2314_v31, %v2302_v5 }
0x1221   :  { %v1203_v34 = vpack.c.bf16 %v1200_v32, %v1199_v33 }
0x1243   :  { %v1191_v26 = vpop.xlane.xlu1 %1190 }
0x1244   :  { %2315 = vrcp.f32 %v1191_v26 }
0x1247   :  { %v1210_v27 = vpop.permute.xlu1 %1209 }
0x1248   :  { %v1223_v7 = vsel %vm336_vm6, %v1210_v27, 0 }
0x1249   :  { %2084 = vmatpush3.bf16.msra.mxu1 %v1223_v7 }
0x124a   :  { %2097 = vmatprep.subr.bf16.mxu1 %v2358_v4 }
0x124c   :  { %2086 = vmatmul.mubr.msk.bf16.vlgmr.msra.gmra.mrb[28].mxu1 %vm446_vm8, %v1202_v29 }
0x124d   :  { %2089 = vmatprep.mubr.msk.bf16.mxu1 %vm2359_vm3, %v2358_v4  ;;  %2098 = vmatpush3.bf16.msra.mxu1 %v2241_v38 }
0x124e   :  { %v2316_v35 = vpop.eup %2315  ;;  %2099 = vmatprep.subr.bf16.mxu1 %v2358_v4 }
0x124f   :  { %v1201_v36 = vmul.f32 %v2316_v35, %v2306_v51 }
0x1251   :  { %v1204_v37 = vpack.c.bf16 %v1201_v36, %v1201_v36  ;;  %2100 = vmatpush3.bf16.msra.mxu1 %v2242_v44 }
0x1252   :  { %2105 = vmatprep.subr.bf16.mxu1 %v2358_v4 }
0x1254   :  { %2090 = vmatmul.mubr.msk.bf16.gmra.mrb[32].mxu1 %vm446_vm8, %v1203_v34 }
0x1255   :  { %2093 = vmatprep.mubr.msk.bf16.mxu1 %vm2359_vm3, %v2358_v4 }
0x125c   :  { %2094 = vmatmul.mubr.msk.bf16.gmra.mrb[36].mxu1 %vm446_vm8, %v1204_v37 }
0x125d   :  { %2101 = vmatprep.mubr.msk.bf16.mxu1 %vm2359_vm3, %v2358_v4 }
0x131f   :  { %v1259_v39 = vpop.f32.mrb[28].mxu1 }
0x1320   :  { %v2087_v40 = vpop.f32.mrb[29].mxu1 }
0x1321   :  { %v1262_v41 = vpop.f32.mrb[30].mxu1 }
0x1322   :  { %v2088_v43 = vpop.f32.mrb[31].mxu1  ;;  %v1283_v63 = vrot.slane %v1262_v41, 2 }
0x1327   :  { %v1267_v61 = vpop.f32.mrb[32].mxu1 }
0x1328   :  { %v1284_v46 = vrot.slane %v1267_v61, 2  ;;  %v2091_v47 = vpop.f32.mrb[33].mxu1  ;;  %v1293_v50 = vrot.slane %v1267_v61, 4 }
0x1329   :  { %v1270_v48 = vpop.f32.mrb[34].mxu1 }
0x132a   :  { %v1285_v49 = vsel %vm346_vm5, %v1283_v63, %v1284_v46  ;;  %v1294_v52 = vrot.slane %v1270_v48, 4  ;;  %v2092_v8 = vpop.f32.mrb[35].mxu1  ;;  %v1303_v58 = vrot.slane %v1270_v48, 6  ;;  %v1884_v48 = vld [vmem:[%s2932_s2 + $0x70] ss:$0 sm:$0xff] }
0x132b   :  { %v2198_v54 = vpack.i.bf16 %v1284_v46, %v1285_v49  ;;  %v1885_v8 = vld [vmem:[%s2932_s2 + $0x71] ss:$0 sm:$0xff] }
0x132c   :  { %v1295_v56 = vsel %vm336_vm6, %v1293_v50, %v1294_v52 }
0x132d   :  { %v2203_v10 = vpack.i.bf16 %v1294_v52, %v1295_v56  ;;  %2199 = vrot.lane.b32.xlu1 %v2198_v54, %s2365_s25 }
0x132f   :  { %2204 = vrot.lane.b32.xlu0 %v2203_v10, %s2366_s26  ;;  %v1275_v57 = vpop.f32.mrb[36].mxu1 }
0x1330   :  { %v1304_v59 = vrot.slane %v1275_v57, 6  ;;  %v2095_v42 = vpop.f32.mrb[37].mxu1 }
0x1331   :  { %v1278_v53 = vpop.f32.mrb[38].mxu1  ;;  %v2247_v42 = vld [vmem:[%s2931_s1 + $0x110] sm:$0xff]  }
0x1332   :  { %v1305_v60 = vsel %vm326_vm4, %v1303_v58, %v1304_v59  ;;  %v2096_v17 = vpop.f32.mrb[39].mxu1  ;;  %v2245_v58 = vld [vmem:[%s2931_s1 + $0x100] sm:$0xff]   ;;  %v2248_v53 = vld [vmem:[%s2931_s1 + $0x118] sm:$0xff]  }
0x1333   :  { %v2208_v62 = vpack.i.bf16 %v1304_v59, %v1305_v60  ;;  %2114 = vmatpush3.bf16.msra.mxu0 %v2245_v58  ;;  %v2246_v59 = vld [vmem:[%s2931_s1 + $0x108] sm:$0xff]   ;;  %v2249_v60 = vld [vmem:[%s2931_s1 + $0x120] sm:$0xff]  }
0x1334   :  { %2115 = vmatprep.subr.bf16.mxu0 %v2358_v4  ;;  %v2250_v17 = vld [vmem:[%s2931_s1 + $0x128] sm:$0xff]  }
0x1335   :  { %2209 = vrot.lane.b32.xlu1 %v2208_v62, %s2367_s27  ;;  %v2251_v62 = vld [vmem:[%s2931_s1 + $0x130] sm:$0xff]   ;;  %v1729_v58 = vld [vmem:[%s2932_s2 + $0x48] sm:$0xff] }
0x1337   :  { %2116 = vmatpush3.bf16.msra.mxu0 %v2246_v59  ;;  %v1730_v59 = vld [vmem:[%s2932_s2 + $0x50] sm:$0xff] }
0x1338   :  { %2117 = vmatprep.subr.bf16.mxu0 %v2358_v4 }
0x133b   :  { %2118 = vmatpush3.bf16.msra.mxu0 %v2247_v42  ;;  %v2158_v42 = vpack.c.bf16 %v1730_v59, %v1729_v58 }
0x133c   :  { %2119 = vmatprep.subr.bf16.mxu0 %v2358_v4 }
0x133f   :  { %2120 = vmatpush3.bf16.msra.mxu0 %v2248_v53 }
0x1340   :  { %2121 = vmatprep.subr.bf16.mxu0 %v2358_v4 }
0x1343   :  { %2122 = vmatpush3.bf16.msra.mxu0 %v2249_v60 }
0x1344   :  { %2123 = vmatprep.subr.bf16.mxu0 %v2358_v4 }
0x1347   :  { %2124 = vmatpush3.bf16.msra.mxu0 %v2250_v17 }
0x1348   :  { %2125 = vmatprep.subr.bf16.mxu0 %v2358_v4 }
0x134b   :  { %2126 = vmatpush3.bf16.msra.mxu0 %v2251_v62 }
0x134c   :  { %2127 = vmatprep.subr.bf16.mxu0 %v2358_v4 }
0x139f   :  { %v2200_v45 = vpop.permute.xlu1 %2199 }
0x13a0   :  { %v2202_v0 = vunpack.i.h.bf16 %v2200_v45  ;;  %v2201_v1 = vunpack.i.l.bf16 %v2200_v45  ;;  %v2252_v45 = vld [vmem:[%s2931_s1 + $0x138] sm:$0xff]  }
0x13a1   :  { %v2205_v2 = vpop.permute.xlu0 %2204  ;;  %2128 = vmatpush3.bf16.msra.mxu0 %v2252_v45 }
0x13a2   :  { %v2207_v5 = vunpack.i.h.bf16 %v2205_v2  ;;  %v2206_v6 = vunpack.i.l.bf16 %v2205_v2  ;;  %v1313_v9 = vsel %vm371_vm7, %v1262_v41, %v2202_v0  ;;  %v1312_v11 = vsel %vm371_vm7, %v1259_v39, %v2201_v1  ;;  %v2244_v39 = vld [vmem:[%s2931_s1 + $0xf8] sm:$0xff]   ;;  %v1886_v0 = vld [vmem:[%s2932_s2 + $0x74] ss:$0 sm:$0xff] }
0x13a4   :  { %v1315_v51 = vsel %vm614_vm9, %v1313_v9, %v2207_v5  ;;  %v1314_v55 = vsel %vm614_vm9, %v1312_v11, %v2206_v6 }
0x13a7   :  { %v2210_v12 = vpop.permute.xlu1 %2209 }
0x13a8   :  { %v2212_v13 = vunpack.i.h.bf16 %v2210_v12  ;;  %v2211_v15 = vunpack.i.l.bf16 %v2210_v12 }
0x13aa   :  { %v1317_v19 = vsel %vm617_vm10, %v1315_v51, %v2212_v13  ;;  %v1316_v21 = vsel %vm617_vm10, %v1314_v55, %v2211_v15 }
0x13ab   :  { %v1322_v22 = vpack.c.bf16 %v1317_v19, %v1316_v21 }
0x13ad   :  { %2102 = vmatmul.mubr.msk.bf16.vlgmr.msra.gmra.mrb[40].mxu1 %vm172_vm1, %v1322_v22 }
0x13ae   :  { %2109 = vmatprep.mubr.msk.bf16.mxu1 %vm2359_vm3, %v2358_v4 }
0x1480   :  { %v1376_v24 = vpop.f32.mrb[40].mxu1 }
0x1481   :  { %v1377_v14 = vadd.f32 %v1880_v23, %v1376_v24  ;;  %v2103_v25 = vpop.f32.mrb[41].mxu1 }
0x1482   :  { %v1379_v26 = vpop.f32.mrb[42].mxu1 }
0x1483   :  { %v2825_v3 = vadd.f32 %v1377_v14, %v2690_v18  ;;  %v1380_v16 = vadd.f32 %v1880_v23, %v1379_v26  ;;  %v2104_v27 = vpop.f32.mrb[43].mxu1 }
0x1485   :  { %v1385_v28 = vsel %vm172_vm1, %v2825_v3, 0.0  ;;  %v1384_v7 = vadd.f32 %v1380_v16, %v2693_v20  ;;  %v2243_v20 = vld [vmem:[%s2931_s1 + $0xf0] sm:$0xff]  }
0x1486   :  { %1386 = vadd.xlane.f32.xlu0 %v1385_v28  ;;  %2106 = vmatpush3.bf16.msra.mxu1 %v2243_v20  ;;  %v1892_v16 = vld [vmem:[%s2932_s2 + $0x75] ss:$0 sm:$0xff]  ;;  %v1644_v20 = vld [vmem:[%s2932_s2 + $0x28] sm:$0xff] }
0x1487   :  { %v1388_v29 = vsel %vm176_vm2, %v1384_v7, 0.0  ;;  %2107 = vmatprep.subr.bf16.mxu1 %v2358_v4 }
0x1488   :  { %1389 = vadd.xlane.f32.xlu1 %v1388_v29 }
0x148a   :  { %2108 = vmatpush3.bf16.msra.mxu1 %v2244_v39 }
0x1513   :  { %v1387_v30 = vpop.xlane.xlu0 %1386 }
0x1514   :  { %v1391_v31 = vmul.f32 0.03125, %v1387_v30 }
0x1515   :  { %v1390_v32 = vpop.xlane.xlu1 %1389 }
0x1516   :  { %v1393_v33 = vsub.f32 %v2825_v3, %v1391_v31  ;;  %v1392_v34 = vmul.f32 0.03125, %v1390_v32 }
0x1518   :  { %v1394_v35 = vsub.f32 %v1384_v7, %v1392_v34  ;;  %v1395_v18 = vmul.f32 %v1393_v33, %v1393_v33 }
0x151a   :  { %v1397_v36 = vsel %vm172_vm1, %v1395_v18, 0.0  ;;  %v1396_v37 = vmul.f32 %v1394_v35, %v1394_v35 }
0x151b   :  { %1398 = vadd.xlane.f32.xlu0 %v1397_v36 }
0x151c   :  { %v1400_v38 = vsel %vm176_vm2, %v1396_v37, 0.0 }
0x151f   :  { %1401 = vadd.xlane.f32.xlu0 %v1400_v38 }
0x15a8   :  { %v1399_v40 = vpop.xlane.xlu0 %1398 }
0x15a9   :  { %v1403_v41 = vmul.f32 0.03125, %v1399_v40  ;;  %v2368_v40 = vmov 0.0|0.0  }
0x15aa   :  { %2151 = vmatprep.subr.bf16.mxu1 %v2368_v40 }
0x15ab   :  { %v1405_v43 = vadd.f32 1e-05, %v1403_v41  ;;  %v1646_v41 = vld [vmem:[%s2932_s2 + $0x38] sm:$0xff] }
0x15ac   :  { %v1402_v44 = vpop.xlane.xlu0 %1401 }
0x15ad   :  { %2317 = vrsqrt.f32 %v1405_v43  ;;  %v1404_v61 = vmul.f32 0.03125, %v1402_v44  ;;  %v1647_v43 = vld [vmem:[%s2932_s2 + $0x40] sm:$0xff] }
0x15ae   :  { %v2155_v44 = vpack.c.bf16 %v1647_v43, %v1646_v41 }
0x15af   :  { %v1406_v63 = vadd.f32 1e-05, %v1404_v61 }
0x15b1   :  { %2319 = vrsqrt.f32 %v1406_v63 }
0x15b7   :  { %v2318_v46 = vpop.eup %2317 }
0x15b8   :  { %v1409_v47 = vmul.f32 %v2318_v46, %v1393_v33 }
0x15ba   :  { %v1415_v50 = vmul.f32 %v1884_v48, %v1409_v47 }
0x15bb   :  { %v2320_v49 = vpop.eup %2319 }
0x15bc   :  { %v1410_v52 = vmul.f32 %v2320_v49, %v1394_v35  ;;  %v1421_v56 = vadd.f32 %v1885_v8, %v1415_v50  ;;  %v1902_v50 = vld [vmem:[%s2932_s2 + $0x65] ss:$0 sm:$0xff] }
0x15be   :  { %v1416_v54 = vmul.f32 %v1884_v48, %v1410_v52  ;;  %v1901_v48 = vld [vmem:[%s2932_s2 + $0x64] ss:$0 sm:$0xff] }
0x15c0   :  { %v1422_v10 = vadd.f32 %v1885_v8, %v1416_v54 }
0x15c2   :  { %v1427_v57 = vpack.c.bf16 %v1422_v10, %v1421_v56 }
0x15c4   :  { %2110 = vmatmul.mubr.msk.bf16.vlgmr.msra.gmra.mrb[44].mxu1 %vm172_vm1, %v1427_v57 }
0x15c5   :  { %2141 = vmatprep.mubr.msk.f32.mxu1 %vm2359_vm3, %v2358_v4 }
0x1697   :  { %v1481_v1 = vpop.f32.mrb[44].mxu1 }
0x1698   :  { %v1482_v2 = vadd.f32 %v1886_v0, %v1481_v1  ;;  %v2111_v5 = vpop.f32.mrb[45].mxu1 }
0x1699   :  { %v1484_v6 = vpop.f32.mrb[46].mxu1 }
0x169a   :  { %v1890_v9 = vmul.f32 -1.702, %v1482_v2  ;;  %v1485_v11 = vadd.f32 %v1886_v0, %v1484_v6  ;;  %v2112_v12 = vpop.f32.mrb[47].mxu1 }
0x169c   :  { %v1492_v13 = vmul.f32 1.442695, %v1890_v9  ;;  %v1891_v15 = vmul.f32 -1.702, %v1485_v11 }
0x169e   :  { %2321 = vpow2.f32 %v1492_v13  ;;  %v1494_v51 = vmul.f32 1.442695, %v1891_v15 }
0x16a0   :  { %2323 = vpow2.f32 %v1494_v51 }
0x16a8   :  { %v2322_v55 = vpop.eup %2321 }
0x16a9   :  { %v1496_v19 = vadd.f32 1.0, %v2322_v55 }
0x16aa   :  { %v2324_v21 = vpop.eup %2323 }
0x16ab   :  { %2325 = vrcp.f32 %v1496_v19  ;;  %v1497_v22 = vadd.f32 1.0, %v2324_v21 }
0x16ad   :  { %2327 = vrcp.f32 %v1497_v22 }
0x16b5   :  { %v2326_v23 = vpop.eup %2325 }
0x16b6   :  { %v1502_v14 = vmul.f32 %v2326_v23, %v1482_v2 }
0x16b7   :  { %v2328_v24 = vpop.eup %2327 }
0x16b8   :  { %v1503_v25 = vmul.f32 %v2328_v24, %v1485_v11 }
0x16ba   :  { %v1520_v26 = vpack.c.bf16 %v1503_v25, %v1502_v14 }
0x16bc   :  { %2130 = vmatmul.mubr.bf16.vlgmr.msra.gmra.mrb[32].mxu0 %v1520_v26 }
0x178f   :  { %v1607_v27 = vpop.f32.mrb[32].mxu0 }
0x1790   :  { %v1608_v28 = vadd.f32 %v1892_v16, %v1607_v27  ;;  %v2131_v7 = vpop.f32.mrb[33].mxu0 }
0x1791   :  { %v1610_v29 = vpop.f32.mrb[34].mxu0 }
0x1792   :  { %v1613_v30 = vadd.f32 %v1608_v28, %v2825_v3  ;;  %v2132_v31 = vpop.f32.mrb[35].mxu0  ;;  %v1645_v3 = vld [vmem:[%s2932_s2 + $0x30] sm:$0xff] }
0x1793   :  { %v2152_v39 = vpack.c.bf16 %v1645_v3, %v1644_v20 }
0x1794   :  { %v1615_v32 = vrot.slane %v1613_v30, 4 }
0x1795   :  { %2153 = vmatpush3.bf16.msra.mxu1 %v2152_v39 }
0x1796   :  { %v1618_v33 = vsel %vm1617_vm11, %v1613_v30, %v1615_v32  ;;  %2154 = vmatprep.subr.bf16.mxu1 %v2368_v40 }
0x1797   :  { %v1621_v34 = vsel %vm176_vm2, %v1618_v33, 0.0 }
0x1798   :  { %1622 = vadd.xlane.f32.xlu0 %v1621_v34 }
0x1799   :  { %2156 = vmatpush3.bf16.msra.mxu1 %v2155_v44 }
0x179a   :  { %2157 = vmatprep.subr.bf16.mxu1 %v2368_v40 }
0x1825   :  { %v1623_v35 = vpop.xlane.xlu0 %1622 }
0x1826   :  { %v1624_v18 = vmul.f32 0.03125, %v1623_v35 }
0x1828   :  { %v1625_v36 = vsub.f32 %v1618_v33, %v1624_v18 }
0x182a   :  { %v1626_v37 = vmul.f32 %v1625_v36, %v1625_v36 }
0x182c   :  { %v1627_v38 = vsel %vm176_vm2, %v1626_v37, 0.0 }
0x182d   :  { %1628 = vadd.xlane.f32.xlu1 %v1627_v38 }
0x18ba   :  { %v1629_v61 = vpop.xlane.xlu1 %1628 }
0x18bb   :  { %v1630_v63 = vmul.f32 0.03125, %v1629_v61 }
0x18bd   :  { %v1631_v46 = vadd.f32 1e-05, %v1630_v63 }
0x18bf   :  { %2329 = vrsqrt.f32 %v1631_v46 }
0x18c9   :  { %v2330_v47 = vpop.eup %2329 }
0x18ca   :  { %v1633_v49 = vmul.f32 %v2330_v47, %v1625_v36 }
0x18cc   :  { %v1638_v52 = vmul.f32 %v1901_v48, %v1633_v49 }
0x18ce   :  { %v1643_v8 = vadd.f32 %v1902_v50, %v1638_v52 }
0x18d0   :  { %2142 = vmatmul.mubr.msk.f32.vlgmr.msra.gmra.mrb[48].mxu1 %vm172_vm1, %v1643_v8 }
0x18d1   :  { %2148 = vmatprep.mubr.msk.f32.mxu1 %vm2359_vm3, %v2358_v4  ;;  %2159 = vmatpush3.bf16.msra.mxu1 %v2158_v42 }
0x19a3   :  { %v1717_v54 = vpop.f32.mrb[48].mxu1 }
0x19a4   :  { %v1721_v56 = vmul.f32 %v1717_v54, %v1717_v54  ;;  %v2143_v10 = vpop.f32.mrb[49].mxu1 }
0x19a6   :  { %v1723_v57 = vsel %vm1722_vm12, %v1721_v56, 0.0 }
0x19a7   :  { %1724 = vadd.xlane.f32.xlu0 %v1723_v57 }
0x1a34   :  { %v1725_v53 = vpop.xlane.xlu0 %1724 }
0x1a35   :  { %v1726_v60 = vadd.f32 1e-12, %v1725_v53 }
0x1a37   :  { %2331 = vrsqrt.f32 %v1726_v60 }
0x1a41   :  { %v2332_v4 = vpop.eup %2331 }
0x1a42   :  { %v1728_v17 = vmul.f32 %v2332_v4, %v1717_v54 }
0x1a44   :  { %2149 = vmatmul.mubr.msk.f32.vlgmr.msra.gmra.mrb[50].mxu1 %vm614_vm9, %v1728_v17 }
0x1b17   :  { %v1800_v62 = vpop.f32.mrb[50].mxu1 }
0x1b18   :  { %1805 = vst.msk [vmem:[#allocation2] sm:$0x3] %vm1804_vm13, %v1800_v62  ;;  %v2150_v45 = vpop.f32.mrb[51].mxu1 }
0x1b19   :  { %2344 = shalt.err (!%p2341_p4)
}
0x1b1a   :  { %s2345_s22 = scalar_lea.hbm %s2933_s3, 32 }
0x1b1b   :  { %p2346_p5 = scmp.ne.s32.totalorder %s2933_s3, %s2345_s22  ;;  %p2349_p6 = scmp.lt.u32.totalorder %s2345_s22, %s2933_s3 }
0x1b1d   :  { %p2351_p7 = pnand %p2349_p6, %p2346_p5 }
0x1b1f   :  { %2354 = shalt.err (!%p2351_p7)
}
0x1b20   :  { %1815 = dma.vmem_to_hbm [thread:$0]  %s1813_s19, 32, %s2933_s3, [#allocation3]  }
0x1b21   :  { %2355 = dma.done.wait [#allocation3], 32  }
0x1b22   :  { %2356 = vsyncadd [#allocation3], 4294967264 }
0x1b23   :  { %1819 = vsyncpa [#allocation3], 1 }

</bundles_post_ra>
